<compile_context>
chip_gen: v6e
topology: v6e:2x2x1
jax: 0.10.0
libtpu: 0.0.40
codegen_flags: <defaults>
</compile_context>

<pallas_src>
import functools

import jax
import jax.numpy as jnp
from jax import lax
from jax.experimental import pallas as pl
from jax.experimental.pallas import tpu as pltpu


COMPUTE_DTYPE = jnp.bfloat16      # MXU-native matmul-input dtype
LN_EPS = 1e-5


def _round_up(x, m):
    return ((x + m - 1) // m) * m


def _vmem_limit_bytes():
    # v5e/v6e: 128 MiB physical VMEM, v7x: 64 MiB -> derive the cap at runtime.
    cap = 128 * 1024 * 1024
    try:
        info = pltpu.get_tpu_info()
        cap = int(getattr(info, "vmem_capacity_bytes", cap))
    except Exception:
        pass
    return int(min(96 * 1024 * 1024, cap * 3 // 4))


def _pick_tile(n, candidates):
    """Largest candidate that divides n and is lane-aligned; else the full dim."""
    for t in candidates:
        if t <= n and n % t == 0 and t % 128 == 0:
            return t
    return n


# --------------------------------------------------------------------------
# Kernel A: fused (channel-major read) LayerNorm + single fused QKV projection
# --------------------------------------------------------------------------
def _ln_qkv_kernel(x_ref, g_ref, b_ref, w_ref, qkv_ref, *, eps):
    # x_ref  : (1, C, TN)   channel-major token tile (folds the NCDHW transpose)
    # g/b    : (C, 1)       LayerNorm affine
    # w_ref  : (C, 3*Cp)    fused, column-padded qkv weight (bf16)
    # qkv_ref: (1, TN, 3*Cp) bf16
    x = x_ref[0].astype(jnp.float32)                        # (C, TN)
    mean = jnp.mean(x, axis=0, keepdims=True)               # (1, TN)  f32 stats
    xc = x - mean
    var = jnp.mean(xc * xc, axis=0, keepdims=True)
    xn = xc * lax.rsqrt(var + eps)
    xn = xn * g_ref[...] + b_ref[...]                       # (C, TN)
    xn = xn.astype(w_ref.dtype)                             # bf16 MXU input

    # (TN, 3*Cp) = xn^T @ W  -- one MXU pass for q|k|v, lane-dense output slab.
    qkv = lax.dot_general(xn, w_ref[...], (((0,), (0,)), ((), ())),
                          preferred_element_type=jnp.float32)
    qkv_ref[0] = qkv.astype(qkv_ref.dtype)


# --------------------------------------------------------------------------
# Kernel B: attention (K/V VMEM-resident per batch) + fused output projection
# --------------------------------------------------------------------------
def _attn_proj_kernel(q_ref, k_ref, v_ref, wp_ref, bp_ref, o_ref, *, scale):
    # q_ref : (1, TQ, Cp) bf16        k_ref / v_ref : (1, N, Cp) bf16
    # wp_ref: (Cp, Cp) bf16           bp_ref: (Cp, 1) f32
    # o_ref : (1, Cp, TQ) f32  channel-major (folds the output transpose)
    q = q_ref[0]                                            # (TQ, Cp)
    k = k_ref[0]                                            # (N,  Cp)
    v = v_ref[0]                                            # (N,  Cp)

    s = lax.dot_general(q, k, (((1,), (1,)), ((), ())),
                        preferred_element_type=jnp.float32) * scale   # (TQ, N)
    m = jnp.max(s, axis=-1, keepdims=True)                  # f32 softmax stats
    p = jnp.exp(s - m)
    l = jnp.sum(p, axis=-1, keepdims=True)

    acc = jnp.dot(p.astype(v.dtype), v,
                  preferred_element_type=jnp.float32)       # (TQ, Cp)
    acc = acc * pl.reciprocal(l, approx=True)

    # o^T = Wp^T @ acc^T  -> directly write the lane-dense (Cp, TQ) slab.
    o_t = lax.dot_general(wp_ref[...], acc.astype(wp_ref.dtype),
                          (((0,), (1,)), ((), ())),
                          preferred_element_type=jnp.float32)          # (Cp, TQ)
    o_ref[0] = (o_t + bp_ref[...]).astype(o_ref.dtype)


# --------------------------------------------------------------------------
# Wrapper: NCDHW in / NCDHW out
# --------------------------------------------------------------------------
def spatio_temporal_self_attention(x, ln_gamma, ln_beta, w_qkv, w_proj, b_proj):
    """x: (B, C, T, H, W).  w_qkv: (3C, C) [PyTorch layout].  w_proj: (C, C)."""
    B, C, T, H, W = x.shape
    N = T * H * W
    Cp = _round_up(C, 128)                 # lane-dense channel padding

    # Free reshape (T,H,W are trailing & contiguous) -- no XLA transpose pass.
    x_cn = x.reshape(B, C, N).astype(jnp.float32)

    # PyTorch Linear computes x @ W^T; transpose + fuse + zero-pad once here.
    w_fused = jnp.zeros((C, 3 * Cp), jnp.float32)
    w_fused = w_fused.at[:, 0:C].set(w_qkv[0:C].T)                 # q cols
    w_fused = w_fused.at[:, Cp:Cp + C].set(w_qkv[C:2 * C].T)       # k cols
    w_fused = w_fused.at[:, 2 * Cp:2 * Cp + C].set(w_qkv[2 * C:].T)  # v cols
    w_fused = w_fused.astype(COMPUTE_DTYPE)

    wp = jnp.zeros((Cp, Cp), jnp.float32).at[:C, :C].set(w_proj.T)
    wp = wp.astype(COMPUTE_DTYPE)
    bp = jnp.zeros((Cp, 1), jnp.float32).at[:C, 0].set(b_proj)
    g_col = ln_gamma.reshape(C, 1).astype(jnp.float32)
    b_col = ln_beta.reshape(C, 1).astype(jnp.float32)

    vmem = _vmem_limit_bytes()
    TN = _pick_tile(N, (1024, 512, 256, 128))
    # Cap TQ so the (TQ, N) f32 score block stays modest and the grid keeps
    # >= 2 tiles at larger N (megacore + pipelining).
    tq_cands = tuple(t for t in (512, 256, 128) if t * N * 4 <= 8 * 1024 * 1024)
    TQ = _pick_tile(N, tq_cands if tq_cands else (128,))

    # ---- Kernel A: LayerNorm + fused QKV projection -> (B, N, 3*Cp) bf16 ----
    qkv = pl.pallas_call(
        functools.partial(_ln_qkv_kernel, eps=LN_EPS),
        out_shape=jax.ShapeDtypeStruct((B, N, 3 * Cp), COMPUTE_DTYPE),
        grid_spec=pltpu.PrefetchScalarGridSpec(
            num_scalar_prefetch=0,
            grid=(B, N // TN),
            in_specs=[
                pl.BlockSpec((1, C, TN), lambda b, i: (b, 0, i)),
                pl.BlockSpec((C, 1), lambda b, i: (0, 0)),
                pl.BlockSpec((C, 1), lambda b, i: (0, 0)),
                pl.BlockSpec((C, 3 * Cp), lambda b, i: (0, 0)),
            ],
            out_specs=pl.BlockSpec((1, TN, 3 * Cp), lambda b, i: (b, i, 0)),
        ),
        compiler_params=pltpu.CompilerParams(
            dimension_semantics=("parallel", "parallel"),
            vmem_limit_bytes=vmem),
    )(x_cn, g_col, b_col, w_fused)

    # ---- Kernel B: attention + fused output projection -> (B, Cp, N) f32 ----
    # K/V blocks cover the full token axis and index only on b, so they are
    # DMA'd once per batch and stay VMEM-resident while q tiles iterate.
    out_cn = pl.pallas_call(
        functools.partial(_attn_proj_kernel, scale=float(C) ** -0.5),
        out_shape=jax.ShapeDtypeStruct((B, Cp, N), jnp.float32),
        grid_spec=pltpu.PrefetchScalarGridSpec(
            num_scalar_prefetch=0,
            grid=(B, N // TQ),
            in_specs=[
                pl.BlockSpec((1, TQ, Cp), lambda b, i: (b, i, 0)),  # Q tile
                pl.BlockSpec((1, N, Cp), lambda b, i: (b, 0, 1)),   # K (resident)
                pl.BlockSpec((1, N, Cp), lambda b, i: (b, 0, 2)),   # V (resident)
                pl.BlockSpec((Cp, Cp), lambda b, i: (0, 0)),        # proj weight
                pl.BlockSpec((Cp, 1), lambda b, i: (0, 0)),         # proj bias
            ],
            out_specs=pl.BlockSpec((1, Cp, TQ), lambda b, i: (b, 0, i)),
        ),
        compiler_params=pltpu.CompilerParams(
            dimension_semantics=("parallel", "parallel"),
            vmem_limit_bytes=vmem),
    )(qkv, qkv, qkv, wp, bp)

    # Slice off channel padding; reshape back to NCDHW (free, channel-major).
    return out_cn[:, :C, :].reshape(B, C, T, H, W)


# --------------------------------------------------------------------------
# Pure-JAX reference (for a sanity check)
# --------------------------------------------------------------------------
def reference_forward(x, ln_gamma, ln_beta, w_qkv, w_proj, b_proj):
    B, C, T, H, W = x.shape
    N = T * H * W
    xt = jnp.transpose(x, (0, 2, 3, 4, 1)).reshape(B, N, C)
    mean = jnp.mean(xt, axis=-1, keepdims=True)
    var = jnp.mean((xt - mean) ** 2, axis=-1, keepdims=True)
    xn = (xt - mean) * jax.lax.rsqrt(var + 1e-5) * ln_gamma + ln_beta
    qkv = xn @ w_qkv.T
    q, k, v = qkv[..., :C], qkv[..., C:2 * C], qkv[..., 2 * C:]
    attn = jax.nn.softmax((q @ jnp.swapaxes(k, -1, -2)) * float(C) ** -0.5,
                          axis=-1)
    o = attn @ v
    o = o @ w_proj.T + b_proj
    o = o.reshape(B, T, H, W, C)
    return jnp.transpose(o, (0, 4, 1, 2, 3))


if __name__ == "__main__":
    # B=2, dim C=32, T=16, H=W=8 -> N = 1024 tokens: multiple q tiles per batch
    # exercise the K/V-resident index map; C=32 exercises lane padding to 128.
    B, C, T, H, W = 2, 32, 16, 8, 8

    key = jax.random.PRNGKey(0)
    kx, kqkv, kp, kb = jax.random.split(key, 4)
    x = jax.random.normal(kx, (B, C, T, H, W), dtype=jnp.float32)
    w_qkv = jax.random.normal(kqkv, (3 * C, C), dtype=jnp.float32) * (C ** -0.5)
    w_proj = jax.random.normal(kp, (C, C), dtype=jnp.float32) * (C ** -0.5)
    b_proj = jax.random.normal(kb, (C,), dtype=jnp.float32) * 0.1
    ln_gamma = jnp.ones((C,), dtype=jnp.float32)   # nn.LayerNorm defaults
    ln_beta = jnp.zeros((C,), dtype=jnp.float32)

    out = spatio_terminal = spatio_temporal_self_attention(
        x, ln_gamma, ln_beta, w_qkv, w_proj, b_proj)
    out = jax.block_until_ready(out)

    ref = reference_forward(x, ln_gamma, ln_beta, w_qkv, w_proj, b_proj)
    assert out.shape == ref.shape == (B, C, T, H, W), (out.shape, ref.shape)
    err = float(jnp.max(jnp.abs(out - ref)))
    # bf16 matmul inputs (f32 accumulation / f32 LN + softmax stats) -> loosened
    # tolerance vs the pure-f32 reference.
    assert err < 5e-2, f"mismatch vs reference: {err}"

    print("KERNEL_OK")
</pallas_src>

<mosaic_0001>
module attributes {stable_mosaic.version = 11 : i64} {
  func.func @_ln_qkv_kernel(%arg0: i32, %arg1: i32, %arg2: memref<1x32x1024xf32, #tpu.memory_space<vmem>>, %arg3: memref<32x1xf32, #tpu.memory_space<vmem>>, %arg4: memref<32x1xf32, #tpu.memory_space<vmem>>, %arg5: memref<32x384xbf16, #tpu.memory_space<vmem>>, %arg6: memref<1x1024x384xbf16, #tpu.memory_space<vmem>>) attributes {dimension_semantics = [#tpu.dimension_semantics<parallel>, #tpu.dimension_semantics<parallel>], iteration_bounds = array<i64: 2, 1>, scalar_prefetch = 0 : i64, scratch_operands = 0 : i64, tpu.core_type = #tpu.core_type<tc>, window_params = [{transform_indices = @transform_0, window_bounds = array<i64: 1, 32, 1024>}, {pipeline_mode = #tpu.pipeline_mode<synchronous>, transform_indices = @transform_1, window_bounds = array<i64: 32, 1>}, {pipeline_mode = #tpu.pipeline_mode<synchronous>, transform_indices = @transform_2, window_bounds = array<i64: 32, 1>}, {pipeline_mode = #tpu.pipeline_mode<synchronous>, transform_indices = @transform_3, window_bounds = array<i64: 32, 384>}, {transform_indices = @transform_4, window_bounds = array<i64: 1, 1024, 384>}]} {
    %c0 = arith.constant 0 : index
    %c0_0 = arith.constant 0 : index
    %c0_1 = arith.constant 0 : index
    %0 = vector.load %arg2[%c0, %c0_0, %c0_1] : memref<1x32x1024xf32, #tpu.memory_space<vmem>>, vector<1x32x1024xf32>
    %1 = vector.shape_cast %0 : vector<1x32x1024xf32> to vector<32x1024xf32>
    %cst = arith.constant dense<0.000000e+00> : vector<1024xf32>
    %2 = vector.multi_reduction <add>, %1, %cst [0] : vector<32x1024xf32> to vector<1024xf32>
    %3 = vector.shape_cast %2 : vector<1024xf32> to vector<1x1024xf32>
    %cst_2 = arith.constant 3.200000e+01 : f32
    %4 = vector.broadcast %cst_2 : f32 to vector<1x1024xf32>
    %5 = arith.divf %3, %4 : vector<1x1024xf32>
    %6 = vector.broadcast %5 : vector<1x1024xf32> to vector<32x1024xf32>
    %7 = arith.subf %1, %6 : vector<32x1024xf32>
    %8 = arith.mulf %7, %7 : vector<32x1024xf32>
    %cst_3 = arith.constant dense<0.000000e+00> : vector<1024xf32>
    %9 = vector.multi_reduction <add>, %8, %cst_3 [0] : vector<32x1024xf32> to vector<1024xf32>
    %10 = vector.shape_cast %9 : vector<1024xf32> to vector<1x1024xf32>
    %cst_4 = arith.constant 3.200000e+01 : f32
    %11 = vector.broadcast %cst_4 : f32 to vector<1x1024xf32>
    %12 = arith.divf %10, %11 : vector<1x1024xf32>
    %cst_5 = arith.constant 9.99999974E-6 : f32
    %13 = vector.broadcast %cst_5 : f32 to vector<1x1024xf32>
    %14 = arith.addf %12, %13 : vector<1x1024xf32>
    %15 = math.rsqrt %14 : vector<1x1024xf32>
    %16 = vector.broadcast %15 : vector<1x1024xf32> to vector<32x1024xf32>
    %17 = arith.mulf %7, %16 : vector<32x1024xf32>
    %c0_6 = arith.constant 0 : index
    %c0_7 = arith.constant 0 : index
    %18 = vector.load %arg3[%c0_6, %c0_7] : memref<32x1xf32, #tpu.memory_space<vmem>>, vector<32x1xf32>
    %19 = vector.broadcast %18 : vector<32x1xf32> to vector<32x1024xf32>
    %20 = arith.mulf %17, %19 : vector<32x1024xf32>
    %c0_8 = arith.constant 0 : index
    %c0_9 = arith.constant 0 : index
    %21 = vector.load %arg4[%c0_8, %c0_9] : memref<32x1xf32, #tpu.memory_space<vmem>>, vector<32x1xf32>
    %22 = vector.broadcast %21 : vector<32x1xf32> to vector<32x1024xf32>
    %23 = arith.addf %20, %22 : vector<32x1024xf32>
    %24 = arith.truncf %23 : vector<32x1024xf32> to vector<32x1024xbf16>
    %c0_10 = arith.constant 0 : index
    %c0_11 = arith.constant 0 : index
    %25 = vector.load %arg5[%c0_10, %c0_11] : memref<32x384xbf16, #tpu.memory_space<vmem>>, vector<32x384xbf16>
    %cst_12 = arith.constant dense<0.000000e+00> : vector<1024x384xf32>
    %26 = tpu.matmul %24, %25, %cst_12 {dimension_numbers = #tpu.dot_dimension_numbers<[0], [0], [1], [1], [0, 1, 1, 1], [], []>} : vector<32x1024xbf16>, vector<32x384xbf16>, vector<1024x384xf32> -> vector<1024x384xf32>
    %27 = arith.truncf %26 : vector<1024x384xf32> to vector<1024x384xbf16>
    %c0_13 = arith.constant 0 : index
    %c0_14 = arith.constant 0 : index
    %c0_15 = arith.constant 0 : index
    %28 = vector.load %arg6[%c0_13, %c0_14, %c0_15] : memref<1x1024x384xbf16, #tpu.memory_space<vmem>>, vector<1x1024x384xbf16>
    %29 = vector.shape_cast %28 : vector<1x1024x384xbf16> to vector<1024x384xbf16>
    %30 = vector.shape_cast %27 : vector<1024x384xbf16> to vector<1x1024x384xbf16>
    tpu.vector_store %arg6[%c0_13, %c0_14, %c0_15], %30 {strides = array<i32>} : memref<1x1024x384xbf16, #tpu.memory_space<vmem>>, vector<1x1024x384xbf16>,
    return
  }
  func.func @transform_0(%arg0: i32, %arg1: i32) -> (i32, i32, i32) {
    %c0_i32 = arith.constant 0 : i32
    %c0_i32_0 = arith.constant 0 : i32
    return %arg0, %c0_i32, %arg1 : i32, i32, i32
  }
  func.func @transform_1(%arg0: i32, %arg1: i32) -> (i32, i32) {
    %c0_i32 = arith.constant 0 : i32
    %c0_i32_0 = arith.constant 0 : i32
    %c0_i32_1 = arith.constant 0 : i32
    return %c0_i32, %c0_i32_0 : i32, i32
  }
  func.func @transform_2(%arg0: i32, %arg1: i32) -> (i32, i32) {
    %c0_i32 = arith.constant 0 : i32
    %c0_i32_0 = arith.constant 0 : i32
    %c0_i32_1 = arith.constant 0 : i32
    return %c0_i32, %c0_i32_0 : i32, i32
  }
  func.func @transform_3(%arg0: i32, %arg1: i32) -> (i32, i32) {
    %c0_i32 = arith.constant 0 : i32
    %c0_i32_0 = arith.constant 0 : i32
    %c0_i32_1 = arith.constant 0 : i32
    return %c0_i32, %c0_i32_0 : i32, i32
  }
  func.func @transform_4(%arg0: i32, %arg1: i32) -> (i32, i32, i32) {
    %c0_i32 = arith.constant 0 : i32
    %c0_i32_0 = arith.constant 0 : i32
    return %arg0, %arg1, %c0_i32 : i32, i32, i32
  }
}

</mosaic_0001>

<bundles_post_ra>
// kernel: tpu_custom_call.1
= control target key start
LH: loop header
LB: loop body
LE: loop exit
PB: predicated region body
PF: predicated region fallthrough
CT: control target
= control target key end

     0   :  { %s6330_s0 = inlined_call_operand.hbm [shape: f32[2,32,1024], index: 0, kind: input, shape index: {}]   ;;  %s6331_s1 = inlined_call_operand.vmem [shape: f32[32,1], index: 1, kind: input, shape index: {}]   ;;  %s6332_s2 = inlined_call_operand.vmem [shape: f32[32,1], index: 2, kind: input, shape index: {}]   ;;  %s6333_s3 = inlined_call_operand.hbm [shape: bf16[32,384], index: 3, kind: input, shape index: {}]   ;;  %s6334_s4 = inlined_call_operand.hbm [shape: bf16[2,1024,384], index: 4, kind: output, shape index: {}]  }
   0x1   :  { %6339 = sst [smem:[#allocation12_spill]] %s6333_s3 }
   0x2   :  { %9 = vsyncpa [#allocation3], 0 }
   0x3   :  { %11 = vsyncpa [#allocation3 + $0x1], 0 }
   0x4   :  { %12 = vsyncpa [#allocation6], 0 }
   0x5   :  { %13 = vsyncpa [#allocation4], 0 }
   0x6   :  { %15 = vsyncpa [#allocation4 + $0x1], 0  ;;  %s5060_s15 = smov 0   ;;  %s5062_s16 = smov 0  }
   0x7   :  { %s5064_s17 = smov 0   ;;  %s5066_s18 = smov 0  }
   0x8   :  { %s5068_s19 = smov 0   ;;  %s5070_s20 = smov 0  }
   0x9 LB: > { %s3914_s21 = sadd.s32 4294967295, %s5023_s20   ;;  %s3915_s22 = sadd.s32 4294967294, %s5023_s20   ;;  %s5023_s20 = sphi %s5070_s20, %s21_s20   ;;  %s5019_s19 = sphi %s5068_s19, %s6360_s19   ;;  %s5015_s18 = sphi %s5066_s18, %s6359_s18   ;;  %s5011_s17 = sphi %s5064_s17, %s6358_s17   ;;  %s5007_s16 = sphi %s5062_s16, %s6357_s16   ;;  %s5003_s15 = sphi %s5060_s15, %s6356_s15  }
   0xa   : > { %p55_p0 = scmp.ne.s32.totalorder %s5007_s16, %s5003_s15  ;;  %p5094_p1 = scmp.eq.s32.totalorder %s3914_s21, 0 }
   0xb   : > { %p5098_p2 = scmp.eq.s32.totalorder %s3914_s21, 1  ;;  %p150_p3 = scmp.eq.s32.totalorder %s3915_s22, 1 }
   0xc   : > { %p5104_p4 = por %p5094_p1, %p55_p0  ;;  %p3916_p5 = scmp.ge.s32.totalorder %s5023_s20, 1 }
   0xd   : > { %p5109_p6 = por %p150_p3, %p55_p0  ;;  %p157_p7 = scmp.lt.s32.totalorder %s5023_s20, 3 }
   0xe   : > { %s6342_s25 = scalar_select %p5104_p4, 1, 0 }
   0xf   : > { %s6343_s26 = scalar_select %p5109_p6, 1, 0 }
  0x10   : > { %p5114_p8 = pnand %p3916_p5, %p157_p7  ;;  %s5025_s28 = smov [#allocation5]  }
  0x11   : > { %s175_s29 = sshll.u32 %s5025_s28, 4  ;;  %s33_s5 = sadd.s32 1, %s5019_s19  ;;  %s176_s29 = int_to_ptr.vmem [resolvable:$true] %s175_s29 }
  0x12   : > { %p4787_p9 = pneg %p5114_p8  ;;  %s4896_s6 = scalar_lea.vmem %s176_s29, 768 }
  0x13   : > { %p4897_p13 = scmp.ne.s32.totalorder %s176_s29, %s4896_s6  ;;  %p4904_p5 = scmp.lt.s32.totalorder %s176_s29, %s176_s29 }
  0x14   : > { %p5123_p11 = pnand %p4787_p9, %p5094_p1  ;;  %p4905_p7 = scmp.lt.s32.totalorder %s4896_s6, %s4896_s6 }
  0x16   : > { %p4887_p12 = pneg %p5123_p11  ;;  %p4906_p6 = por %p4905_p7, %p4904_p5 }
  0x18   : > { %p4899_p0 = pnand %p4897_p13, %p4887_p12 }
  0x1a   : > { %p4900_p3 = pneg %p4899_p0 }
  0x1c   : > { %p4907_p4 = pnand %p4906_p6, %p4900_p3 }
  0x1e   : > { %4910 = shalt.err (!%p4907_p4)
}
  0x1f   : > { %s5026_s7 = smov 192   ;;  %s5027_s8 = smov 12  }
  0x20   : > { %s6346_s3 = sld [smem:[#allocation12_spill]]  ;;  %p35_p6 = scmp.ge.s32.totalorder %s33_s5, 2 }
  0x21   : > { %s42_s11 = sadd.s32 1, %s5011_s17  ;;  %p49_p4 = scmp.ne.s32.totalorder %s5011_s17, %s5007_s16 }
  0x22   : > { %p50_p9 = scmp.eq.s32.totalorder %s5023_s20, 0  ;;  %s6362_s5 = smov (%p35_p6, %s33_s5), 0 }
  0x23   : > { %p5147_p13 = por %p5098_p2, %p49_p4  ;;  %s37_s14 = ssub.s32 %s5019_s19, %s6362_s5 }
  0x24   : > { %p5141_p12 = por %p50_p9, %p49_p4  ;;  %p4800_p0 = scmp.lt.s32.totalorder %s5023_s20, 2 }
  0x25   : > { %s189_s21 = sand.u32 1, %s5011_s17  }
  0x26   : > { %4790 = dma.hbm_to_vmem [thread:$0]  (!%p5123_p11), %s6346_s3, 768, %s176_s29, [#allocation6], %s5026_s7, %s5026_s7, %s5027_s8  }
  0x27   : > { %p40_p11 = scmp.eq.s32.totalorder %s37_s14, 0  ;;  %s3919_s22 = sshll.u32 %s189_s21, 8 }
  0x28   : > { %s4318_s29 = sshll.u32 %s5019_s19, 12  ;;  %s193_s8 = scalar_lea.vmem [#allocation2], %s3919_s22 }
  0x29   : > { %s5156_s28 = scalar_select %p40_p11, %s5011_s17, %s42_s11  }
  0x2a   : > { %s201_s7 = scalar_lea.hbm %s6330_s0, %s4318_s29  ;;  %s202_s9 = sshll.u32 %s193_s8, 4  ;;  %s203_s9 = int_to_ptr.vmem [resolvable:$true] %s202_s9 }
  0x2b   : > { %p5164_p2 = pnand %p4800_p0, %p5141_p12  ;;  %s190_s10 = scalar_lea.sflag [#allocation3], %s189_s21 }
  0x2c   : > { %s4924_s14 = scalar_lea.vmem %s203_s9, 4096  ;;  %s5028_s11 = smov [#allocation2]  }
  0x2d   : > { %p4913_p3 = pneg %p5164_p2  ;;  %p4925_p5 = scmp.ne.s32.totalorder %s203_s9, %s4924_s14 }
  0x2e   : > { %s4929_s3 = sshll.u32 %s5028_s11, 4  ;;  %s4930_s3 = int_to_ptr.vmem [resolvable:$false] %s4929_s3 }
  0x2f   : > { %p4927_p7 = pnand %p4925_p5, %p4913_p3  ;;  %s4931_s29 = scalar_lea.vmem %s4930_s3, 8192 }
  0x30   : > { %p4932_p4 = scmp.lt.s32.totalorder %s203_s9, %s4930_s3  ;;  %p4933_p9 = scmp.lt.s32.totalorder %s4931_s29, %s4924_s14 }
  0x31   : > { %p4928_p6 = pneg %p4927_p7 }
  0x32   : > { %p4934_p11 = por %p4933_p9, %p4932_p4 }
  0x34   : > { %p4935_p10 = pnand %p4934_p11, %p4928_p6 }
  0x36   : > { %4938 = shalt.err (!%p4935_p10)
}
  0x37   : > { %s5029_s12 = smov 1024   ;;  %s5030_s22 = smov 64  }
  0x38   : > { %4794 = dma.hbm_to_vmem [thread:$0]  (!%p5164_p2), %s201_s7, 4096, %s203_s9, %s190_s10, %s5029_s12, %s5029_s12, %s5030_s22  }
  0x39   : > { %214 = sbr.rel (%p5114_p8) target bundleno = 898 (0x382), region = 36 }
  0x3e   : > { %s5175_s21 = sand.u32 1, %s5007_s16   ;;  %p6350_p12 = scmp.ne.s32.totalorder %s6342_s25, 0 }
  0x3f   : > { %s3923_s30 = sshll.u32 %s5175_s21, 8  ;;  %s217_s3 = scalar_lea.sflag [#allocation3], %s5175_s21 }
  0x40   : > { %s5179_s6 = scalar_lea.vmem [#allocation2], %s3923_s30 }
  0x41   : > { %4990 = dma.done.wait (%p6350_p12), %s217_s3, 4096  }
  0x42   : > { %4992 = vsyncadd (%p6350_p12), %s217_s3, 4294963200 }
  0x43   : > { %4994 = dma.done.wait (%p5094_p1), [#allocation6], 768  }
  0x44   : > { %4996 = vsyncadd (%p5094_p1), [#allocation6], 4294966528  ;;  %v6336_v0 = vmov 0   ;;  %v559_v1 = vld [vmem:[%s6331_s1 + $0x10] sm:$0xff]  ;;  %v557_v2 = vld [vmem:[%s6331_s1] sm:$0xff]  ;;  %vm853_vm0 = vcmask 261120  }
  0x45   : > { %4860 = vset.pattern.permute.xlu1 %v6336_v0  ;;  %4859 = vset.pattern.permute.xlu0 %v6336_v0  ;;  %v560_v3 = vld [vmem:[%s6331_s1 + $0x18] sm:$0xff]  ;;  %v558_v4 = vld [vmem:[%s6331_s1 + $0x8] sm:$0xff]  ;;  %v613_v6 = vld [vmem:[%s6332_s2] sm:$0xff]  ;;  %s4778_s25 = smul.u32 24576, %s5015_s18  ;;  %s3801_s18 = scalar_lea.sflag [#allocation4], %s5175_s21 }
  0x46   : > { %1078 = vmatprep.mubr.bf16.mxu0 %v6336_v0  ;;  %1558 = vmatprep.mubr.bf16.mxu1 %v6336_v0  ;;  %v614_v5 = vld [vmem:[%s6332_s2 + $0x8] sm:$0xff]  ;;  %v616_v7 = vld [vmem:[%s6332_s2 + $0x18] sm:$0xff]  ;;  %v615_v8 = vld [vmem:[%s6332_s2 + $0x10] sm:$0xff]  ;;  %s5032_s14 = smov [#allocation7]  }
  0x47   : > { %573 = vperm.xlu1 %4860, %v559_v1   ;;  %563 = vperm.xlu0 %4859, %v557_v2   ;;  %v5218_v9 = vld [vmem:[%s5179_s6 + $0x30] sm:$0xff]  ;;  %v5224_v11 = vld [vmem:[%s5179_s6] sm:$0xff]  ;;  %v5230_v13 = vld [vmem:[%s5179_s6 + $0x18] sm:$0xff]  ;;  %s6278_s24 = scalar_lea.hbm %s6334_s4, %s4778_s25  ;;  %s4943_s11 = sshll.u32 %s5032_s14, 4  ;;  %s4944_s11 = int_to_ptr.vmem [resolvable:$false] %s4943_s11 }
  0x48   : > { %v5221_v10 = vld [vmem:[%s5179_s6 + $0x70] sm:$0xff]  ;;  %v5227_v12 = vld [vmem:[%s5179_s6 + $0x40] sm:$0xff]  ;;  %v5233_v14 = vld [vmem:[%s5179_s6 + $0x58] sm:$0xff]  ;;  %s4945_s29 = scalar_lea.vmem %s4944_s11, 49152 }
  0x49   : > { %v338_v15 = vadd.f32 %v5221_v10, %v5218_v9  ;;  %v5238_v16 = vld [vmem:[%s5179_s6 + $0x10] sm:$0xff]  ;;  %v284_v19 = vadd.f32 %v5227_v12, %v5224_v11  ;;  %v5249_v20 = vld [vmem:[%s5179_s6 + $0x28] sm:$0xff]  ;;  %v5255_v22 = vld [vmem:[%s5179_s6 + $0x80] sm:$0xff]  ;;  %v311_v23 = vadd.f32 %v5233_v14, %v5230_v13 }
  0x4a   : > { %v5241_v17 = vld [vmem:[%s5179_s6 + $0x50] sm:$0xff]  ;;  %v5252_v21 = vld [vmem:[%s5179_s6 + $0x68] sm:$0xff]  ;;  %v5260_v24 = vld [vmem:[%s5179_s6 + $0x98] sm:$0xff] }
  0x4b   : > { %578 = vperm.xlu1 %4860, %v560_v3   ;;  %568 = vperm.xlu0 %4859, %v558_v4   ;;  %v5244_v18 = vld [vmem:[%s5179_s6 + $0xb0] sm:$0xff]  ;;  %v302_v25 = vadd.f32 %v5241_v17, %v5238_v16  ;;  %v5265_v26 = vld [vmem:[%s5179_s6 + $0x20] sm:$0xff]  ;;  %v329_v31 = vadd.f32 %v5252_v21, %v5249_v20  ;;  %v285_v32 = vadd.f32 %v284_v19, %v5255_v22  ;;  %v5281_v33 = vld [vmem:[%s5179_s6 + $0x38] sm:$0xff] }
  0x4c   : > { %v5268_v27 = vld [vmem:[%s5179_s6 + $0x60] sm:$0xff]  ;;  %v5271_v28 = vld [vmem:[%s5179_s6 + $0xf0] sm:$0xff]  ;;  %v339_v29 = vadd.f32 %v338_v15, %v5244_v18  ;;  %v5284_v34 = vld [vmem:[%s5179_s6 + $0x78] sm:$0xff]  ;;  %v312_v37 = vadd.f32 %v311_v23, %v5260_v24 }
  0x4d   : > { %v5275_v30 = vld [vmem:[%s5179_s6 + $0x90] sm:$0xff]  ;;  %v5287_v35 = vld [vmem:[%s5179_s6 + $0xa8] sm:$0xff]  ;;  %v5290_v36 = vld [vmem:[%s5179_s6 + $0xc0] sm:$0xff]  ;;  %v320_v38 = vadd.f32 %v5268_v27, %v5265_v26  ;;  %v347_v43 = vadd.f32 %v5284_v34, %v5281_v33 }
  0x4e   : > { %v5296_v39 = vld [vmem:[%s5179_s6 + $0xd8] sm:$0xff]  ;;  %v303_v40 = vadd.f32 %v302_v25, %v5275_v30  ;;  %v5300_v41 = vld [vmem:[%s5179_s6 + $0xa0] sm:$0xff]  ;;  %v340_v42 = vadd.f32 %v339_v29, %v5271_v28  ;;  %v5306_v44 = vld [vmem:[%s5179_s6 + $0xd0] sm:$0xff]  ;;  %v330_v45 = vadd.f32 %v329_v31, %v5287_v35  ;;  %v286_v46 = vadd.f32 %v285_v32, %v5290_v36 }
  0x4f   : > { %624 = vperm.xlu1 %4860, %v614_v5   ;;  %619 = vperm.xlu0 %4859, %v613_v6   ;;  %v5311_v47 = vld [vmem:[%s5179_s6 + $0xb8] sm:$0xff]  ;;  %v5314_v48 = vld [vmem:[%s5179_s6 + $0xe8] sm:$0xff]  ;;  %v313_v51 = vadd.f32 %v312_v37, %v5296_v39  ;;  %v321_v52 = vadd.f32 %v320_v38, %v5300_v41  ;;  %v5326_v54 = vld [vmem:[%s5179_s6 + $0xe0] sm:$0xff] }
  0x50   : > { %v5317_v49 = vld [vmem:[%s5179_s6 + $0x8] sm:$0xff]  ;;  %v304_v53 = vadd.f32 %v303_v40, %v5306_v44  ;;  %v341_v55 = vrot.slane %v340_v42, 4  ;;  %v348_v56 = vadd.f32 %v347_v43, %v5311_v47  ;;  %v331_v57 = vadd.f32 %v330_v45, %v5314_v48  ;;  %v5331_v59 = vld [vmem:[%s5179_s6 + $0xf8] sm:$0xff] }
  0x51   : > { %v5320_v50 = vld [vmem:[%s5179_s6 + $0x48] sm:$0xff]  ;;  %v287_v58 = vrot.slane %v286_v46, 4  ;;  %v314_v62 = vrot.slane %v313_v51, 4  ;;  %v322_v63 = vadd.f32 %v321_v52, %v5326_v54 }
  0x52   : > { %v293_v60 = vadd.f32 %v5320_v50, %v5317_v49  ;;  %v5336_v61 = vld [vmem:[%s5179_s6 + $0x88] sm:$0xff]  ;;  %v305_v1 = vrot.slane %v304_v53, 4  ;;  %v342_v2 = vadd.f32 %v341_v55, %v340_v42  ;;  %v349_v3 = vadd.f32 %v348_v56, %v5331_v59 }
  0x53   : > { %634 = vperm.xlu1 %4860, %v616_v7   ;;  %629 = vperm.xlu0 %4859, %v615_v8   ;;  %v332_v4 = vrot.slane %v331_v57, 4  ;;  %v288_v5 = vadd.f32 %v287_v58, %v286_v46  ;;  %v5342_v7 = vld [vmem:[%s5179_s6 + $0xc8] sm:$0xff]  ;;  %v315_v8 = vadd.f32 %v314_v62, %v313_v51  ;;  %v323_v15 = vrot.slane %v322_v63, 4  ;;  %s4777_s6 = smul.u32 1536, %s5175_s21 }
  0x54   : > { %v294_v6 = vadd.f32 %v293_v60, %v5336_v61  ;;  %6351 = vst [vmem:[#allocation11_spill] sm:$0xff] %v5342_v7  ;;  %v306_v19 = vadd.f32 %v305_v1, %v304_v53  ;;  %v343_v23 = vrot.slane %v342_v2, 2  ;;  %v350_v25 = vrot.slane %v349_v3, 4 }
  0x55   : > { %v333_v29 = vadd.f32 %v332_v4, %v331_v57  ;;  %v289_v31 = vrot.slane %v288_v5, 2  ;;  %v316_v37 = vrot.slane %v315_v8, 2  ;;  %v324_v38 = vadd.f32 %v323_v15, %v322_v63  ;;  %s5845_s7 = scalar_lea.vmem [#allocation7], %s4777_s6 }
  0x56   : > { %v295_v32 = vadd.f32 %v294_v6, %v5342_v7  ;;  %v307_v40 = vrot.slane %v306_v19, 2  ;;  %v344_v42 = vadd.f32 %v343_v23, %v342_v2  ;;  %v351_v43 = vadd.f32 %v350_v25, %v349_v3  ;;  %s3817_s8 = sshll.u32 %s5845_s7, 4  ;;  %s6280_s8 = int_to_ptr.vmem [resolvable:$true] %s3817_s8 }
  0x57   : > { %v334_v45 = vrot.slane %v333_v29, 2  ;;  %v290_v46 = vadd.f32 %v289_v31, %v288_v5  ;;  %v317_v55 = vadd.f32 %v316_v37, %v315_v8  ;;  %v325_v56 = vrot.slane %v324_v38, 2  ;;  %s4939_s10 = scalar_lea.vmem %s6280_s8, 24576  ;;  %p4946_p0 = scmp.lt.s32.totalorder %s6280_s8, %s4944_s11 }
  0x58   : > { %v296_v52 = vrot.slane %v295_v32, 4  ;;  %v308_v58 = vadd.f32 %v307_v40, %v306_v19  ;;  %v345_v51 = vrot.slane %v344_v42, 1  ;;  %v352_v60 = vrot.slane %v351_v43, 2  ;;  %p4940_p1 = scmp.ne.s32.totalorder %s6280_s8, %s4939_s10  ;;  %p4947_p2 = scmp.lt.s32.totalorder %s4945_s29, %s4939_s10 }
  0x59   : > { %v335_v53 = vadd.f32 %v334_v45, %v333_v29  ;;  %v291_v62 = vrot.slane %v290_v46, 1  ;;  %v318_v57 = vrot.slane %v317_v55, 1  ;;  %v326_v4 = vadd.f32 %v325_v56, %v324_v38 }
  0x5a   : > { %v297_v1 = vadd.f32 %v296_v52, %v295_v32  ;;  %v309_v0 = vrot.slane %v308_v58, 1  ;;  %v346_v6 = vadd.f32 %v345_v51, %v344_v42  ;;  %v353_v7 = vadd.f32 %v352_v60, %v351_v43  ;;  %p4941_p8 = pnand %p4940_p1, %p5147_p13  ;;  %p4948_p3 = por %p4947_p2, %p4946_p0 }
  0x5b   : > { %v336_v63 = vrot.slane %v335_v53, 1  ;;  %v292_v15 = vadd.f32 %v291_v62, %v290_v46  ;;  %v319_v3 = vadd.f32 %v318_v57, %v317_v55  ;;  %v327_v23 = vrot.slane %v326_v4, 1 }
  0x5c   : > { %v298_v2 = vrot.slane %v297_v1, 2  ;;  %v310_v5 = vadd.f32 %v309_v0, %v308_v58  ;;  %v363_v25 = vmul.f32 0.03125, %v346_v6  ;;  %v354_v8 = vrot.slane %v353_v7, 1  ;;  %p4942_p10 = pneg %p4941_p8 }
  0x5d   : > { %v337_v31 = vadd.f32 %v336_v63, %v335_v53  ;;  %v357_v19 = vmul.f32 0.03125, %v292_v15  ;;  %v360_v40 = vmul.f32 0.03125, %v319_v3  ;;  %v328_v29 = vadd.f32 %v327_v23, %v326_v4 }
  0x5e   : > { %v299_v37 = vadd.f32 %v298_v2, %v297_v1  ;;  %v359_v45 = vmul.f32 0.03125, %v310_v5  ;;  %v5346_v32 = vsub.f32 %v5218_v9, %v363_v25  ;;  %v5349_v38 = vsub.f32 %v5221_v10, %v363_v25  ;;  %p4949_p5 = pnand %p4948_p3, %p4942_p10 }
  0x5f   : > { %v355_v42 = vadd.f32 %v354_v8, %v353_v7  ;;  %v362_v43 = vmul.f32 0.03125, %v337_v31  ;;  %v5352_v46 = vsub.f32 %v5244_v18, %v363_v25  ;;  %v5355_v0 = vsub.f32 %v5224_v11, %v357_v19 }
  0x60   : > { %v5358_v52 = vsub.f32 %v5227_v12, %v357_v19  ;;  %v300_v55 = vrot.slane %v299_v37, 1  ;;  %v5361_v56 = vsub.f32 %v5271_v28, %v363_v25  ;;  %v5364_v9 = vsub.f32 %v5230_v13, %v360_v40 }
  0x61   : > { %v5367_v10 = vsub.f32 %v5233_v14, %v360_v40  ;;  %v361_v7 = vmul.f32 0.03125, %v328_v29  ;;  %v5370_v18 = vsub.f32 %v5255_v22, %v357_v19  ;;  %v5373_v11 = vsub.f32 %v5290_v36, %v357_v19 }
  0x62   : > { %v5376_v12 = vsub.f32 %v5238_v16, %v359_v45  ;;  %v5379_v58 = vsub.f32 %v5241_v17, %v359_v45  ;;  %v403_v13 = vmul.f32 %v5346_v32, %v5346_v32  ;;  %v411_v14 = vmul.f32 %v5349_v38, %v5349_v38 }
  0x63   : > { %v5386_v28 = vsub.f32 %v5249_v20, %v362_v43  ;;  %v5389_v22 = vsub.f32 %v5252_v21, %v362_v43  ;;  %v419_v36 = vmul.f32 %v5352_v46, %v5352_v46  ;;  %v397_v16 = vmul.f32 %v5355_v0, %v5355_v0 }
  0x64   : > { %v405_v17 = vmul.f32 %v5358_v52, %v5358_v52  ;;  %v5398_v51 = vsub.f32 %v5260_v24, %v360_v40  ;;  %v400_v60 = vmul.f32 %v5364_v9, %v5364_v9  ;;  %v408_v20 = vmul.f32 %v5367_v10, %v5367_v10 }
  0x65   : > { %v5405_v21 = vsub.f32 %v5265_v26, %v361_v7  ;;  %v5408_v53 = vsub.f32 %v5268_v27, %v361_v7  ;;  %v427_v62 = vmul.f32 %v5361_v56, %v5361_v56  ;;  %v5413_v1 = vsub.f32 %v5275_v30, %v359_v45 }
  0x66   : > { %v399_v24 = vmul.f32 %v5376_v12, %v5376_v12  ;;  %v407_v57 = vmul.f32 %v5379_v58, %v5379_v58  ;;  %v483_v4 = vadd.f32 %v411_v14, %v403_v13  ;;  %v5420_v6 = vsub.f32 %v5287_v35, %v362_v43 }
  0x67   : > { %v402_v26 = vmul.f32 %v5386_v28, %v5386_v28  ;;  %v410_v27 = vmul.f32 %v5389_v22, %v5389_v22  ;;  %v413_v30 = vmul.f32 %v5370_v18, %v5370_v18  ;;  %v429_v63 = vadd.f32 %v405_v17, %v397_v16 }
  0x68   : > { %v5429_v15 = vsub.f32 %v5296_v39, %v360_v40  ;;  %v416_v2 = vmul.f32 %v5398_v51, %v5398_v51  ;;  %v456_v3 = vadd.f32 %v408_v20, %v400_v60  ;;  %v5434_v35 = vsub.f32 %v5300_v41, %v361_v7 }
  0x69   : > { %v401_v23 = vmul.f32 %v5405_v21, %v5405_v21  ;;  %v409_v5 = vmul.f32 %v5408_v53, %v5408_v53  ;;  %v421_v25 = vmul.f32 %v5373_v11, %v5373_v11  ;;  %v5443_v8 = vsub.f32 %v5306_v44, %v359_v45 }
  0x6a   : > { %v415_v39 = vmul.f32 %v5413_v1, %v5413_v1  ;;  %v447_v31 = vadd.f32 %v407_v57, %v399_v24  ;;  %v484_v19 = vadd.f32 %v483_v4, %v419_v36  ;;  %v5448_v41 = vsub.f32 %v5314_v48, %v362_v43 }
  0x6b   : > { %v418_v40 = vmul.f32 %v5420_v6, %v5420_v6  ;;  %v474_v29 = vadd.f32 %v410_v27, %v402_v26  ;;  %v430_v13 = vadd.f32 %v429_v63, %v413_v30  ;;  %v364_v14 = vmul.f32 0.03125, %v355_v42 }
  0x6c   : > { %v301_v16 = vadd.f32 %v300_v55, %v299_v37  ;;  %v424_v17 = vmul.f32 %v5429_v15, %v5429_v15  ;;  %v457_v44 = vadd.f32 %v456_v3, %v416_v2  ;;  %v5455_v45 = vsub.f32 %v5326_v54, %v361_v7 }
  0x6d   : > { %v417_v36 = vmul.f32 %v5434_v35, %v5434_v35  ;;  %v465_v60 = vadd.f32 %v409_v5, %v401_v23  ;;  %v423_v48 = vmul.f32 %v5443_v8, %v5443_v8  ;;  %v448_v43 = vadd.f32 %v447_v31, %v415_v39 }
  0x6e   : > { %v485_v20 = vadd.f32 %v484_v19, %v427_v62  ;;  %v426_v42 = vmul.f32 %v5448_v41, %v5448_v41  ;;  %v475_v37 = vadd.f32 %v474_v29, %v418_v40  ;;  %v431_v55 = vadd.f32 %v430_v13, %v421_v25 }
  0x6f   : > { %v5464_v24 = vsub.f32 %v5281_v33, %v364_v14  ;;  %v5467_v54 = vsub.f32 %v5284_v34, %v364_v14  ;;  %v358_v7 = vmul.f32 0.03125, %v301_v16  ;;  %v458_v57 = vadd.f32 %v457_v44, %v424_v17 }
  0x70   : > { %v425_v4 = vmul.f32 %v5455_v45, %v5455_v45  ;;  %v466_v26 = vadd.f32 %v465_v60, %v417_v36  ;;  %v449_v27 = vadd.f32 %v448_v43, %v423_v48  ;;  %v486_v30 = vrot.slane %v485_v20, 4 }
  0x71   : > { %v476_v62 = vadd.f32 %v475_v37, %v426_v42  ;;  %v432_v63 = vrot.slane %v431_v55, 4  ;;  %v5472_v2 = vsub.f32 %v5311_v47, %v364_v14  ;;  %v404_v33 = vmul.f32 %v5464_v24, %v5464_v24 }
  0x72   : > { %v412_v34 = vmul.f32 %v5467_v54, %v5467_v54  ;;  %v5479_v3 = vsub.f32 %v5317_v49, %v358_v7  ;;  %v5482_v23 = vsub.f32 %v5320_v50, %v358_v7  ;;  %v459_v5 = vrot.slane %v458_v57, 4 }
  0x73   : > { %v467_v25 = vadd.f32 %v466_v26, %v425_v4  ;;  %v450_v39 = vrot.slane %v449_v27, 4  ;;  %v487_v31 = vadd.f32 %v486_v30, %v485_v20  ;;  %v5485_v19 = vsub.f32 %v5331_v59, %v364_v14  ;;  %v6352_v20 = vld [vmem:[#allocation11_spill] sm:$0xff] }
  0x74   : > { %v477_v47 = vrot.slane %v476_v62, 4  ;;  %v433_v40 = vadd.f32 %v432_v63, %v431_v55  ;;  %v420_v29 = vmul.f32 %v5472_v2, %v5472_v2  ;;  %v492_v13 = vadd.f32 %v412_v34, %v404_v33 }
  0x75   : > { %v5490_v16 = vsub.f32 %v5336_v61, %v358_v7  ;;  %v398_v49 = vmul.f32 %v5479_v3, %v5479_v3  ;;  %v406_v50 = vmul.f32 %v5482_v23, %v5482_v23  ;;  %v460_v17 = vadd.f32 %v459_v5, %v458_v57 }
  0x76   : > { %v468_v44 = vrot.slane %v467_v25, 4  ;;  %v451_v36 = vadd.f32 %v450_v39, %v449_v27  ;;  %v488_v59 = vrot.slane %v487_v31, 2  ;;  %v478_v14 = vadd.f32 %v477_v47, %v476_v62 }
  0x77   : > { %v434_v60 = vrot.slane %v433_v40, 2  ;;  %v428_v48 = vmul.f32 %v5485_v19, %v5485_v19  ;;  %v493_v43 = vadd.f32 %v492_v13, %v420_v29  ;;  %v5499_v42 = vsub.f32 %v6352_v20, %v358_v7 }
  0x78   : > { %v414_v61 = vmul.f32 %v5490_v16, %v5490_v16  ;;  %v438_v37 = vadd.f32 %v406_v50, %v398_v49  ;;  %v461_v55 = vrot.slane %v460_v17, 2  ;;  %v469_v4 = vadd.f32 %v468_v44, %v467_v25  ;;  %v4861_v44 = vld [vmem:[#allocation5 + $0x1c] ss:$12 sps:$4 sm:$0xff]  }
  0x79   : > { %v452_v26 = vrot.slane %v451_v36, 2  ;;  %v489_v57 = vadd.f32 %v488_v59, %v487_v31  ;;  %v479_v30 = vrot.slane %v478_v14, 2  ;;  %v435_v27 = vadd.f32 %v434_v60, %v433_v40  ;;  %v4863_v31 = vld [vmem:[#allocation5 + $0x18] ss:$12 sps:$4 sm:$0xff]   ;;  %4773 = vmatprep.subr.bf16.mxu1 %v4861_v44  ;;  %1058 = vmatprep.subr.bf16.mxu0 %v4861_v44 }
  0x7a   : > { %v422_v62 = vmul.f32 %v5499_v42, %v5499_v42  ;;  %v494_v63 = vadd.f32 %v493_v43, %v428_v48  ;;  %v439_v33 = vadd.f32 %v438_v37, %v414_v61  ;;  %v462_v34 = vadd.f32 %v461_v55, %v460_v17  ;;  %4775 = vmatpush1.bf16.msra.mxu1 %v4863_v31  ;;  %v4866_v37 = vld [vmem:[#allocation5] ss:$12 sps:$4 sm:$0xff]  }
  0x7b   : > { %v470_v5 = vrot.slane %v469_v4, 2  ;;  %v453_v39 = vadd.f32 %v452_v26, %v451_v36  ;;  %v490_v7 = vrot.slane %v489_v57, 1  ;;  %v480_v47 = vadd.f32 %v479_v30, %v478_v14  ;;  %1059 = vmatpush1.bf16.msra.mxu0 %v4863_v31  ;;  %v4864_v14 = vld [vmem:[#allocation5 + $0x4] ss:$12 sps:$4 sm:$0xff]   ;;  %v5505_v55 = vld [vmem:[#allocation5 + $0x20] ss:$12 sps:$4 sm:$0xff]  }
  0x7c   : > { %v436_v29 = vrot.slane %v435_v27, 1  ;;  %v495_v13 = vrot.slane %v494_v63, 4  ;;  %v440_v20 = vadd.f32 %v439_v33, %v422_v62  ;;  %v463_v49 = vrot.slane %v462_v34, 1  ;;  %4774 = vmatprep.subr.bf16.mxu1 %v4864_v14  ;;  %1060 = vmatprep.subr.bf16.mxu0 %v4864_v14 }
  0x7d   : > { %v471_v50 = vadd.f32 %v470_v5, %v469_v4  ;;  %v454_v25 = vrot.slane %v453_v39, 1  ;;  %v491_v59 = vadd.f32 %v490_v7, %v489_v57  ;;  %v481_v40 = vrot.slane %v480_v47, 1 }
  0x7e   : > { %v437_v60 = vadd.f32 %v436_v29, %v435_v27  ;;  %v496_v48 = vadd.f32 %v495_v13, %v494_v63  ;;  %v441_v43 = vrot.slane %v440_v20, 4  ;;  %v464_v17 = vadd.f32 %v463_v49, %v462_v34  ;;  %4776 = vmatpush1.bf16.msra.mxu1 %v4866_v37 }
  0x7f   : > { %v472_v61 = vrot.slane %v471_v50, 1  ;;  %v455_v36 = vadd.f32 %v454_v25, %v453_v39  ;;  %v507_v4 = vmul.f32 0.03125, %v491_v59  ;;  %v482_v26 = vadd.f32 %v481_v40, %v480_v47  ;;  %1061 = vmatpush1.bf16.msra.mxu0 %v4866_v37  ;;  %4641 = vmatprep.subr.bf16.mxu1 %v5505_v55 }
  0x80   : > { %v501_v30 = vmul.f32 0.03125, %v437_v60  ;;  %v497_v57 = vrot.slane %v496_v48, 2  ;;  %v442_v27 = vadd.f32 %v441_v43, %v440_v20  ;;  %v504_v62 = vmul.f32 0.03125, %v464_v17 }
  0x81   : > { %v473_v33 = vadd.f32 %v472_v61, %v471_v50  ;;  %v503_v63 = vmul.f32 0.03125, %v455_v36  ;;  %v515_v34 = vadd.f32 1e-05, %v507_v4  ;;  %v506_v5 = vmul.f32 0.03125, %v482_v26 }
  0x82   : > { %v509_v39 = vadd.f32 1e-05, %v501_v30  ;;  %v498_v7 = vadd.f32 %v497_v57, %v496_v48  ;;  %v443_v29 = vrot.slane %v442_v27, 2  ;;  %v512_v13 = vadd.f32 1e-05, %v504_v62 }
  0x83   : > { %v505_v49 = vmul.f32 0.03125, %v473_v33  ;;  %v511_v47 = vadd.f32 1e-05, %v503_v63  ;;  %4869 = vrsqrt.f32 %v515_v34  ;;  %v514_v25 = vadd.f32 1e-05, %v506_v5 }
  0x84   : > { %4871 = vrsqrt.f32 %v509_v39  ;;  %v499_v44 = vrot.slane %v498_v7, 1  ;;  %v444_v20 = vadd.f32 %v443_v29, %v442_v27 }
  0x85   : > { %4873 = vrsqrt.f32 %v512_v13  ;;  %v513_v50 = vadd.f32 1e-05, %v505_v49 }
  0x86   : > { %4875 = vrsqrt.f32 %v511_v47  ;;  %v500_v31 = vadd.f32 %v499_v44, %v498_v7  ;;  %v445_v59 = vrot.slane %v444_v20, 1 }
  0x87   : > { %4877 = vrsqrt.f32 %v514_v25 }
  0x88   : > { %4879 = vrsqrt.f32 %v513_v50  ;;  %v508_v40 = vmul.f32 0.03125, %v500_v31  ;;  %v446_v60 = vadd.f32 %v445_v59, %v444_v20 }
  0x8a   : > { %v516_v36 = vadd.f32 1e-05, %v508_v40  ;;  %v502_v14 = vmul.f32 0.03125, %v446_v60 }
  0x8c   : > { %4881 = vrsqrt.f32 %v516_v36  ;;  %v510_v39 = vadd.f32 1e-05, %v502_v14 }
  0x8e   : > { %4883 = vrsqrt.f32 %v510_v39 }
  0x90   : > { %v4870_v43 = vpop.eup %4869 }
  0x91   : > { %v4872_v48 = vpop.eup %4871  ;;  %v531_v30 = vmul.f32 %v4870_v43, %v5346_v32  ;;  %v539_v57 = vmul.f32 %v4870_v43, %v5349_v38  ;;  %v547_v34 = vmul.f32 %v4870_v43, %v5352_v46  ;;  %v555_v5 = vmul.f32 %v4870_v43, %v5361_v56 }
  0x92   : > { %v5512_v37 = vpop.eup %4873  ;;  %v525_v27 = vmul.f32 %v4872_v48, %v5355_v0  ;;  %v533_v62 = vmul.f32 %v4872_v48, %v5358_v52  ;;  %v541_v29 = vmul.f32 %v4872_v48, %v5370_v18  ;;  %v549_v32 = vmul.f32 %v4872_v48, %v5373_v11 }
  0x93   : > { %v5514_v4 = vpop.eup %4875  ;;  %v544_v38 = vmul.f32 %v5512_v37, %v5398_v51  ;;  %v552_v0 = vmul.f32 %v5512_v37, %v5429_v15 }
  0x94   : > { %v4878_v26 = vpop.eup %4877  ;;  %v543_v52 = vmul.f32 %v5514_v4, %v5413_v1  ;;  %v551_v46 = vmul.f32 %v5514_v4, %v5443_v8 }
  0x95   : > { %v4880_v7 = vpop.eup %4879  ;;  %v530_v56 = vmul.f32 %v4878_v26, %v5386_v28  ;;  %v538_v13 = vmul.f32 %v4878_v26, %v5389_v22  ;;  %v546_v28 = vmul.f32 %v4878_v26, %v5420_v6  ;;  %v554_v22 = vmul.f32 %v4878_v26, %v5448_v41 }
  0x96   : > { %v529_v1 = vmul.f32 %v4880_v7, %v5405_v21  ;;  %v537_v8 = vmul.f32 %v4880_v7, %v5408_v53  ;;  %v545_v21 = vmul.f32 %v4880_v7, %v5434_v35  ;;  %v553_v53 = vmul.f32 %v4880_v7, %v5455_v45 }
  0xc2   : > { %v5508_v17 = vpop.permute.xlu1 %573  ;;  %v5510_v61 = vpop.permute.xlu0 %563 }
  0xc3   : > { %v587_v18 = vmul.f32 %v5510_v61, %v531_v30  ;;  %v581_v49 = vmul.f32 %v5510_v61, %v525_v27  ;;  %v603_v31 = vmul.f32 %v5508_v17, %v547_v34  ;;  %v597_v59 = vmul.f32 %v5508_v17, %v541_v29 }
  0xc4   : > { %v600_v60 = vmul.f32 %v5508_v17, %v544_v38  ;;  %v599_v14 = vmul.f32 %v5508_v17, %v543_v52  ;;  %v586_v26 = vmul.f32 %v5510_v61, %v530_v56  ;;  %v585_v35 = vmul.f32 %v5510_v61, %v529_v1 }
  0xc5   : > { %v602_v34 = vmul.f32 %v5508_v17, %v546_v28 }
  0xc6   : > { %v5520_v33 = vpop.permute.xlu1 %578  ;;  %v5522_v63 = vpop.permute.xlu0 %568 }
  0xc7   : > { %v595_v11 = vmul.f32 %v5522_v63, %v539_v57  ;;  %v589_v51 = vmul.f32 %v5522_v63, %v533_v62  ;;  %v611_v41 = vmul.f32 %v5520_v33, %v555_v5  ;;  %v605_v36 = vmul.f32 %v5520_v33, %v549_v32 }
  0xc8   : > { %v608_v62 = vmul.f32 %v5520_v33, %v552_v0  ;;  %v601_v5 = vmul.f32 %v5508_v17, %v545_v21  ;;  %v607_v29 = vmul.f32 %v5520_v33, %v551_v46  ;;  %v594_v32 = vmul.f32 %v5522_v63, %v538_v13 }
  0xc9   : > { %v593_v38 = vmul.f32 %v5522_v63, %v537_v8  ;;  %v610_v0 = vmul.f32 %v5520_v33, %v554_v22 }
  0xca   : > { %v5542_v47 = vpop.permute.xlu1 %624  ;;  %v5544_v15 = vpop.permute.xlu0 %619 }
  0xcb   : > { %v643_v25 = vadd.f32 %v5544_v15, %v587_v18  ;;  %v651_v44 = vadd.f32 %v5542_v47, %v595_v11  ;;  %v637_v20 = vadd.f32 %v5544_v15, %v581_v49  ;;  %v645_v50 = vadd.f32 %v5542_v47, %v589_v51  ;;  %v4882_v18 = vpop.eup %4881 }
  0xcc   : > { %v5592_v13 = vadd.f32 %v5544_v15, %v586_v26  ;;  %v609_v49 = vmul.f32 %v5520_v33, %v553_v53  ;;  %v5598_v1 = vadd.f32 %v5542_v47, %v594_v32  ;;  %v5601_v8 = vadd.f32 %v5544_v15, %v585_v35 }
  0xcd   : > { %v675_v40 = vpack.c.bf16 %v651_v44, %v643_v25  ;;  %v669_v6 = vpack.c.bf16 %v645_v50, %v637_v20  ;;  %v649_v28 = vadd.f32 %v5542_v47, %v593_v38  ;;  %v548_v35 = vmul.f32 %v4882_v18, %v5472_v2 }
  0xce   : > { %v5560_v43 = vpop.permute.xlu1 %634  ;;  %v5562_v48 = vpop.permute.xlu0 %629  ;;  %v674_v50 = vpack.c.bf16 %v5598_v1, %v5592_v13 }
  0xcf   : > { %789 = vxpose.xlu1.c.b16.start [1/2] (short) %v675_v40, 128  ;;  %693 = vxpose.xlu0.c.b16.start [1/2] (short) %v669_v6, 128  ;;  %v659_v45 = vadd.f32 %v5562_v48, %v603_v31  ;;  %v667_v30 = vadd.f32 %v5560_v43, %v611_v41  ;;  %v653_v57 = vadd.f32 %v5562_v48, %v597_v59  ;;  %v4884_v40 = vpop.eup %4883 }
  0xd0   : > { %v661_v27 = vadd.f32 %v5560_v43, %v605_v36  ;;  %v5579_v56 = vadd.f32 %v5562_v48, %v600_v60  ;;  %v5582_v39 = vadd.f32 %v5560_v43, %v608_v62  ;;  %v5586_v11 = vadd.f32 %v5562_v48, %v599_v14 }
  0xd1   : > { %v683_v7 = vpack.c.bf16 %v667_v30, %v659_v45  ;;  %v5589_v46 = vadd.f32 %v5560_v43, %v607_v29  ;;  %v658_v25 = vadd.f32 %v5562_v48, %v602_v34  ;;  %v666_v44 = vadd.f32 %v5560_v43, %v610_v0 }
  0xd2   : > { %v677_v52 = vpack.c.bf16 %v661_v27, %v653_v57  ;;  %v680_v51 = vpack.c.bf16 %v5582_v39, %v5579_v56  ;;  %v657_v20 = vadd.f32 %v5562_v48, %v601_v5  ;;  %v673_v31 = vpack.c.bf16 %v649_v28, %v5601_v8 }
  0xd3   : > { %790 = vxpose.xlu1.c.b16.end [2/2] (short) %v683_v7, 128  ;;  %v679_v22 = vpack.c.bf16 %v5589_v46, %v5586_v11  ;;  %v665_v59 = vadd.f32 %v5560_v43, %v609_v49  ;;  %v682_v21 = vpack.c.bf16 %v666_v44, %v658_v25  ;;  %v532_v6 = vmul.f32 %v4882_v18, %v5464_v24 }
  0xd4   : > { %694 = vxpose.xlu0.c.b16.end [2/2] (short) %v677_v52, 128  ;;  %v540_v41 = vmul.f32 %v4882_v18, %v5467_v54  ;;  %v526_v60 = vmul.f32 %v4884_v40, %v5479_v3  ;;  %v534_v36 = vmul.f32 %v4884_v40, %v5482_v23  ;;  %v556_v45 = vmul.f32 %v4882_v18, %v5485_v19 }
  0xd5   : > { %v681_v53 = vpack.c.bf16 %v665_v59, %v657_v20  ;;  %v588_v14 = vmul.f32 %v5510_v61, %v532_v6  ;;  %v542_v24 = vmul.f32 %v4884_v40, %v5490_v16  ;;  %v550_v54 = vmul.f32 %v4884_v40, %v5499_v42 }
  0xd6   : > { %v596_v26 = vmul.f32 %v5522_v63, %v540_v41  ;;  %v582_v30 = vmul.f32 %v5510_v61, %v526_v60  ;;  %v590_v57 = vmul.f32 %v5522_v63, %v534_v36  ;;  %v604_v2 = vmul.f32 %v5508_v17, %v548_v35 }
  0xd7   : > { %v644_v3 = vadd.f32 %v5544_v15, %v588_v14  ;;  %v612_v19 = vmul.f32 %v5520_v33, %v556_v45  ;;  %v598_v34 = vmul.f32 %v5508_v17, %v542_v24  ;;  %v606_v5 = vmul.f32 %v5520_v33, %v550_v54 }
  0xd8   : > { %v652_v23 = vadd.f32 %v5542_v47, %v596_v26  ;;  %v638_v27 = vadd.f32 %v5544_v15, %v582_v30  ;;  %v646_v62 = vadd.f32 %v5542_v47, %v590_v57  ;;  %v660_v16 = vadd.f32 %v5562_v48, %v604_v2 }
  0xd9   : > { %v668_v42 = vadd.f32 %v5560_v43, %v612_v19  ;;  %v654_v32 = vadd.f32 %v5562_v48, %v598_v34  ;;  %v662_v38 = vadd.f32 %v5560_v43, %v606_v5  ;;  %v528_v17 = vmul.f32 %v5512_v37, %v5364_v9 }
  0xda   : > { %v676_v7 = vpack.c.bf16 %v652_v23, %v644_v3  ;;  %v670_v29 = vpack.c.bf16 %v646_v62, %v638_v27  ;;  %v536_v33 = vmul.f32 %v5512_v37, %v5367_v10  ;;  %v527_v39 = vmul.f32 %v5514_v4, %v5376_v12 }
  0xdb   : > { %v684_v52 = vpack.c.bf16 %v668_v42, %v660_v16  ;;  %v678_v56 = vpack.c.bf16 %v662_v38, %v654_v32  ;;  %v535_v48 = vmul.f32 %v5514_v4, %v5379_v58  ;;  %v584_v43 = vmul.f32 %v5510_v61, %v528_v17 }
  0xdc   : > { %v592_v0 = vmul.f32 %v5522_v63, %v536_v33  ;;  %v583_v18 = vmul.f32 %v5510_v61, %v527_v39  ;;  %v4868_v61 = vld [vmem:[#allocation5 + $0x8] ss:$12 sps:$4 sm:$0xff]  }
  0xdd   : > { %v591_v11 = vmul.f32 %v5522_v63, %v535_v48  ;;  %v640_v46 = vadd.f32 %v5544_v15, %v584_v43  ;;  %v6353_v63 = vmov 0  }
  0xde   : > { %v648_v9 = vadd.f32 %v5542_v47, %v592_v0  ;;  %v639_v10 = vadd.f32 %v5544_v15, %v583_v18 }
  0xdf   : > { %v647_v37 = vadd.f32 %v5542_v47, %v591_v11 }
  0xe0   : > { %v672_v12 = vpack.c.bf16 %v648_v9, %v640_v46 }
  0xe1   : > { %v671_v13 = vpack.c.bf16 %v647_v37, %v639_v10 }
  0xec   : > { %805 = vxpose.xlu1.c.b16.start [1/2] (short) %v676_v7, 128 }
  0xed   : > { %709 = vxpose.xlu0.c.b16.start [1/2] (short) %v670_v29, 128 }
  0xf0   : > { %806 = vxpose.xlu1.c.b16.end [2/2] (short) %v684_v52, 128 }
  0xf1   : > { %710 = vxpose.xlu0.c.b16.end [2/2] (short) %v678_v56, 128 }
 0x109   : > { %741 = vxpose.xlu1.c.b16.start [1/2] (short) %v672_v12, 128 }
 0x10a   : > { %725 = vxpose.xlu0.c.b16.start [1/2] (short) %v671_v13, 128 }
 0x10d   : > { %742 = vxpose.xlu1.c.b16.end [2/2] (short) %v680_v51, 128 }
 0x10e   : > { %726 = vxpose.xlu0.c.b16.end [2/2] (short) %v679_v22, 128 }
 0x126   : > { %773 = vxpose.xlu1.c.b16.start [1/2] (short) %v674_v50, 128 }
 0x127   : > { %757 = vxpose.xlu0.c.b16.start [1/2] (short) %v673_v31, 128 }
 0x12a   : > { %774 = vxpose.xlu1.c.b16.end [2/2] (short) %v682_v21, 128 }
 0x12b   : > { %758 = vxpose.xlu0.c.b16.end [2/2] (short) %v681_v53, 128 }
 0x131   : > { %v5653_v58 = vpop.trf.xlu1 }
 0x132   : > { %v5655_v4 = vpop.trf.xlu0  ;;  %3979 = vmatmul.mubr.msk.bf16.vlgmr.msra.gmra.mxu1 %vm853_vm0, %v5653_v58 }
 0x133   : > { %3931 = vmatmul.mubr.msk.bf16.vlgmr.msra.gmra.mxu0 %vm853_vm0, %v5655_v4  ;;  %4642 = vmatpush3.bf16.msra.mxu1 %v5505_v55 }
 0x134   : > { %1568 = vmatprep.mubr.bf16.mxu1 %v6353_v63  ;;  %1088 = vmatprep.mubr.bf16.mxu0 %v6353_v63 }
 0x135   : > { %4643 = vmatprep.subr.bf16.mxu1 %v4868_v61  ;;  %v5664_v47 = vpop.trf.xlu1 }
 0x136   : > { %v5666_v15 = vpop.trf.xlu0 }
 0x137   : > { %4644 = vmatpush3.bf16.msra.mxu1 %v4868_v61 }
 0x139   : > { %v5674_v55 = vpop.trf.xlu1 }
 0x13a   : > { %3980 = vmatmul.mubr.msk.bf16.gmra.mxu1 %vm853_vm0, %v5664_v47  ;;  %v5676_v49 = vpop.trf.xlu0 }
 0x13b   : > { %3932 = vmatmul.mubr.msk.bf16.gmra.mxu0 %vm853_vm0, %v5666_v15  ;;  %1578 = vmatprep.mubr.bf16.mxu1 %v6353_v63 }
 0x13c   : > { %1098 = vmatprep.mubr.bf16.mxu0 %v6353_v63 }
 0x13d   : > { %v5684_v51 = vpop.trf.xlu1 }
 0x13e   : > { %v5686_v1 = vpop.trf.xlu0 }
 0x141   : > { %v5694_v8 = vpop.trf.xlu1 }
 0x142   : > { %3981 = vmatmul.mubr.msk.bf16.gmra.mxu1 %vm853_vm0, %v5674_v55  ;;  %v5696_v28 = vpop.trf.xlu0 }
 0x143   : > { %3933 = vmatmul.mubr.msk.bf16.gmra.mxu0 %vm853_vm0, %v5676_v49  ;;  %1588 = vmatprep.mubr.bf16.mxu1 %v6353_v63 }
 0x144   : > { %1108 = vmatprep.mubr.bf16.mxu0 %v6353_v63 }
 0x145   : > { %v5704_v22 = vpop.trf.xlu1 }
 0x146   : > { %v5706_v25 = vpop.trf.xlu0 }
 0x149   : > { %v5714_v44 = vpop.trf.xlu1 }
 0x14a   : > { %3982 = vmatmul.mubr.msk.bf16.gmra.mxu1 %vm853_vm0, %v5684_v51  ;;  %v5716_v20 = vpop.trf.xlu0 }
 0x14b   : > { %3934 = vmatmul.mubr.msk.bf16.gmra.mxu0 %vm853_vm0, %v5686_v1  ;;  %1598 = vmatprep.mubr.bf16.mxu1 %v6353_v63 }
 0x14c   : > { %1118 = vmatprep.mubr.bf16.mxu0 %v6353_v63 }
 0x14d   : > { %v5724_v50 = vpop.trf.xlu1 }
 0x14e   : > { %v5726_v31 = vpop.trf.xlu0 }
 0x151   : > { %v5734_v59 = vpop.trf.xlu1 }
 0x152   : > { %3983 = vmatmul.mubr.msk.bf16.gmra.mxu1 %vm853_vm0, %v5694_v8  ;;  %v5736_v21 = vpop.trf.xlu0 }
 0x153   : > { %3935 = vmatmul.mubr.msk.bf16.gmra.mxu0 %vm853_vm0, %v5696_v28  ;;  %1608 = vmatprep.mubr.bf16.mxu1 %v6353_v63 }
 0x154   : > { %1128 = vmatprep.mubr.bf16.mxu0 %v6353_v63 }
 0x155   : > { %v5744_v53 = vpop.trf.xlu1 }
 0x156   : > { %v718_v40 = vpop.trf.xlu0 }
 0x159   : > { %v5751_v6 = vpop.trf.xlu1 }
 0x15a   : > { %3984 = vmatmul.mubr.msk.bf16.gmra.mxu1 %vm853_vm0, %v5704_v22  ;;  %v719_v41 = vpop.trf.xlu0 }
 0x15b   : > { %3936 = vmatmul.mubr.msk.bf16.gmra.mxu0 %vm853_vm0, %v5706_v25  ;;  %1618 = vmatprep.mubr.bf16.mxu1 %v6353_v63 }
 0x15c   : > { %1138 = vmatprep.mubr.bf16.mxu0 %v6353_v63 }
 0x15d   : > { %v5758_v60 = vpop.trf.xlu1 }
 0x15e   : > { %v720_v36 = vpop.trf.xlu0 }
 0x161   : > { %v5765_v14 = vpop.trf.xlu1 }
 0x162   : > { %3985 = vmatmul.mubr.msk.bf16.gmra.mxu1 %vm853_vm0, %v5714_v44  ;;  %v721_v26 = vpop.trf.xlu0 }
 0x163   : > { %3937 = vmatmul.mubr.msk.bf16.gmra.mxu0 %vm853_vm0, %v5716_v20  ;;  %1628 = vmatprep.mubr.bf16.mxu1 %v6353_v63 }
 0x164   : > { %1148 = vmatprep.mubr.bf16.mxu0 %v6353_v63 }
 0x165   : > { %v5772_v35 = vpop.trf.xlu1 }
 0x166   : > { %v722_v45 = vpop.trf.xlu0 }
 0x169   : > { %v5779_v30 = vpop.trf.xlu1 }
 0x16a   : > { %3986 = vmatmul.mubr.msk.bf16.gmra.mxu1 %vm853_vm0, %v5724_v50  ;;  %v723_v57 = vpop.trf.xlu0 }
 0x16b   : > { %3938 = vmatmul.mubr.msk.bf16.gmra.mxu0 %vm853_vm0, %v5726_v31  ;;  %1638 = vmatprep.mubr.bf16.mxu1 %v6353_v63 }
 0x16c   : > { %1158 = vmatprep.mubr.bf16.mxu0 %v6353_v63 }
 0x16d   : > { %v5786_v24 = vpop.trf.xlu1 }
 0x16e   : > { %v724_v54 = vpop.trf.xlu0 }
 0x171   : > { %v5837_v7 = vpop.trf.xlu1 }
 0x172   : > { %3987 = vmatmul.mubr.msk.bf16.gmra.mxu1 %vm853_vm0, %v5734_v59  ;;  %v733_v3 = vpop.trf.xlu0 }
 0x173   : > { %3939 = vmatmul.mubr.msk.bf16.gmra.mxu0 %vm853_vm0, %v5736_v21  ;;  %1648 = vmatprep.mubr.bf16.mxu1 %v6353_v63 }
 0x174   : > { %1168 = vmatprep.mubr.bf16.mxu0 %v6353_v63 }
 0x175   : > { %v5849_v39 = vpop.trf.xlu1 }
 0x176   : > { %v734_v23 = vpop.trf.xlu0 }
 0x17a   : > { %3988 = vmatmul.mubr.msk.bf16.gmra.mxu1 %vm853_vm0, %v5744_v53  ;;  %v735_v27 = vpop.trf.xlu0 }
 0x17b   : > { %3940 = vmatmul.mubr.msk.bf16.gmra.mxu0 %vm853_vm0, %v718_v40  ;;  %1658 = vmatprep.mubr.bf16.mxu1 %v6353_v63 }
 0x17c   : > { %1178 = vmatprep.mubr.bf16.mxu0 %v6353_v63 }
 0x17e   : > { %v736_v62 = vpop.trf.xlu0 }
 0x182   : > { %3989 = vmatmul.mubr.msk.bf16.gmra.mxu1 %vm853_vm0, %v5751_v6  ;;  %v737_v2 = vpop.trf.xlu0 }
 0x183   : > { %3941 = vmatmul.mubr.msk.bf16.gmra.mxu0 %vm853_vm0, %v719_v41  ;;  %1668 = vmatprep.mubr.bf16.mxu1 %v6353_v63 }
 0x184   : > { %1188 = vmatprep.mubr.bf16.mxu0 %v6353_v63 }
 0x186   : > { %v738_v19 = vpop.trf.xlu0 }
 0x18a   : > { %3990 = vmatmul.mubr.msk.bf16.gmra.mxu1 %vm853_vm0, %v5758_v60  ;;  %v739_v34 = vpop.trf.xlu0 }
 0x18b   : > { %3942 = vmatmul.mubr.msk.bf16.gmra.mxu0 %vm853_vm0, %v720_v36  ;;  %1678 = vmatprep.mubr.bf16.mxu1 %v6353_v63 }
 0x18c   : > { %1198 = vmatprep.mubr.bf16.mxu0 %v6353_v63 }
 0x18e   : > { %v5830_v5 = vpop.trf.xlu0 }
 0x192   : > { %3991 = vmatmul.mubr.msk.bf16.gmra.mxu1 %vm853_vm0, %v5765_v14 }
 0x193   : > { %3943 = vmatmul.mubr.msk.bf16.gmra.mxu0 %vm853_vm0, %v721_v26  ;;  %1688 = vmatprep.mubr.bf16.mxu1 %v6353_v63 }
 0x194   : > { %1208 = vmatprep.mubr.bf16.mxu0 %v6353_v63 }
 0x19a   : > { %3992 = vmatmul.mubr.msk.bf16.gmra.mxu1 %vm853_vm0, %v5772_v35 }
 0x19b   : > { %3944 = vmatmul.mubr.msk.bf16.gmra.mxu0 %vm853_vm0, %v722_v45  ;;  %1698 = vmatprep.mubr.bf16.mxu1 %v6353_v63 }
 0x19c   : > { %1218 = vmatprep.mubr.bf16.mxu0 %v6353_v63 }
 0x1a2   : > { %3993 = vmatmul.mubr.msk.bf16.gmra.mxu1 %vm853_vm0, %v5779_v30 }
 0x1a3   : > { %3945 = vmatmul.mubr.msk.bf16.gmra.mxu0 %vm853_vm0, %v723_v57  ;;  %1708 = vmatprep.mubr.bf16.mxu1 %v6353_v63 }
 0x1a4   : > { %1228 = vmatprep.mubr.bf16.mxu0 %v6353_v63 }
 0x1aa   : > { %3994 = vmatmul.mubr.msk.bf16.gmra.mxu1 %vm853_vm0, %v5786_v24 }
 0x1ab   : > { %3946 = vmatmul.mubr.msk.bf16.gmra.mxu0 %vm853_vm0, %v724_v54  ;;  %4645 = vmatprep.mubr.msk.bf16.mxu1 %vm853_vm0, %v5655_v4  ;;  %v751_v4 = vpop.trf.xlu1 }
 0x1ac   : > { %1238 = vmatprep.mubr.bf16.mxu0 %v6353_v63 }
 0x1b2   : > { %4646 = vmatmul.mubr.msk.bf16.vlgmr.msra.gmra.mxu1 %vm853_vm0, %v5666_v15 }
 0x1b3   : > { %3947 = vmatmul.mubr.msk.bf16.gmra.mxu0 %vm853_vm0, %v733_v3  ;;  %4649 = vmatprep.mubr.msk.bf16.mxu1 %vm853_vm0, %v5676_v49 }
 0x1b4   : > { %1248 = vmatprep.mubr.bf16.mxu0 %v6353_v63 }
 0x1ba   : > { %4650 = vmatmul.mubr.msk.bf16.gmra.mxu1 %vm853_vm0, %v5686_v1 }
 0x1bb   : > { %3948 = vmatmul.mubr.msk.bf16.gmra.mxu0 %vm853_vm0, %v734_v23  ;;  %4653 = vmatprep.mubr.msk.bf16.mxu1 %vm853_vm0, %v5696_v28 }
 0x1bc   : > { %1258 = vmatprep.mubr.bf16.mxu0 %v6353_v63 }
 0x1c2   : > { %4654 = vmatmul.mubr.msk.bf16.gmra.mxu1 %vm853_vm0, %v5706_v25 }
 0x1c3   : > { %3949 = vmatmul.mubr.msk.bf16.gmra.mxu0 %vm853_vm0, %v735_v27  ;;  %4657 = vmatprep.mubr.msk.bf16.mxu1 %vm853_vm0, %v5716_v20 }
 0x1c4   : > { %1268 = vmatprep.mubr.bf16.mxu0 %v6353_v63 }
 0x1ca   : > { %4658 = vmatmul.mubr.msk.bf16.gmra.mxu1 %vm853_vm0, %v5726_v31 }
 0x1cb   : > { %3950 = vmatmul.mubr.msk.bf16.gmra.mxu0 %vm853_vm0, %v736_v62  ;;  %4661 = vmatprep.mubr.msk.bf16.mxu1 %vm853_vm0, %v5736_v21 }
 0x1cc   : > { %1278 = vmatprep.mubr.bf16.mxu0 %v6353_v63 }
 0x1d2   : > { %4662 = vmatmul.mubr.msk.bf16.gmra.mxu1 %vm853_vm0, %v718_v40 }
 0x1d3   : > { %3951 = vmatmul.mubr.msk.bf16.gmra.mxu0 %vm853_vm0, %v737_v2  ;;  %4665 = vmatprep.mubr.msk.bf16.mxu1 %vm853_vm0, %v719_v41 }
 0x1d4   : > { %1288 = vmatprep.mubr.bf16.mxu0 %v6353_v63 }
 0x1da   : > { %4666 = vmatmul.mubr.msk.bf16.gmra.mxu1 %vm853_vm0, %v720_v36 }
 0x1db   : > { %3952 = vmatmul.mubr.msk.bf16.gmra.mxu0 %vm853_vm0, %v738_v19  ;;  %4669 = vmatprep.mubr.msk.bf16.mxu1 %vm853_vm0, %v721_v26 }
 0x1dc   : > { %1298 = vmatprep.mubr.bf16.mxu0 %v6353_v63 }
 0x1e2   : > { %4670 = vmatmul.mubr.msk.bf16.gmra.mxu1 %vm853_vm0, %v722_v45  ;;  %v752_v45 = vpop.trf.xlu1 }
 0x1e3   : > { %3953 = vmatmul.mubr.msk.bf16.gmra.mxu0 %vm853_vm0, %v739_v34  ;;  %4673 = vmatprep.mubr.msk.bf16.mxu1 %vm853_vm0, %v723_v57 }
 0x1e4   : > { %1308 = vmatprep.mubr.bf16.mxu0 %v6353_v63 }
 0x1ea   : > { %4674 = vmatmul.mubr.msk.bf16.gmra.mxu1 %vm853_vm0, %v724_v54 }
 0x1eb   : > { %3954 = vmatmul.mubr.msk.bf16.gmra.mxu0 %vm853_vm0, %v5830_v5  ;;  %4677 = vmatprep.mubr.msk.bf16.mxu1 %vm853_vm0, %v733_v3 }
 0x1ec   : > { %1318 = vmatprep.mubr.bf16.mxu0 %v6353_v63 }
 0x1f2   : > { %v1560_v16 = vpop.f32.mrf.mxu1  ;;  %4678 = vmatmul.mubr.msk.bf16.gmra.mxu1 %vm853_vm0, %v734_v23 }
 0x1f3   : > { %v1080_v42 = vpop.f32.mrf.mxu0  ;;  %3955 = vmatmul.mubr.msk.bf16.gmra.mxu0 %vm853_vm0, %v5837_v7  ;;  %4681 = vmatprep.mubr.msk.bf16.mxu1 %vm853_vm0, %v735_v27 }
 0x1f4   : > { %v1562_v29 = vpop.f32.mrf.mxu1  ;;  %1328 = vmatprep.mubr.bf16.mxu0 %v6353_v63 }
 0x1f5   : > { %v1082_v32 = vpop.f32.mrf.mxu0  ;;  %v4511_v38 = vpack.c.bf16 %v1562_v29, %v1560_v16  ;;  %v753_v29 = vpop.trf.xlu1 }
 0x1f6   : > { %v4319_v52 = vpack.c.bf16 %v1082_v32, %v1080_v42  ;;  %v1564_v56 = vpop.f32.mrf.mxu1 }
 0x1f7   : > { %3736 = vst [vmem:[%s5845_s7 + $0x480] sm:$0xff] %v4511_v38  ;;  %v1084_v17 = vpop.f32.mrf.mxu0 }
 0x1f8   : > { %3544 = vst [vmem:[%s5845_s7] sm:$0xff] %v4319_v52  ;;  %v1566_v33 = vpop.f32.mrf.mxu1 }
 0x1f9   : > { %v1086_v48 = vpop.f32.mrf.mxu0  ;;  %v4513_v43 = vpack.c.bf16 %v1566_v33, %v1564_v56 }
 0x1fa   : > { %v4321_v0 = vpack.c.bf16 %v1086_v48, %v1084_v17  ;;  %v1570_v18 = vpop.f32.mrf.mxu1  ;;  %4682 = vmatmul.mubr.msk.bf16.gmra.mxu1 %vm853_vm0, %v736_v62 }
 0x1fb   : > { %3738 = vst [vmem:[%s5845_s7 + $0x48c] sm:$0xff] %v4513_v43  ;;  %v1090_v11 = vpop.f32.mrf.mxu0  ;;  %3956 = vmatmul.mubr.msk.bf16.gmra.mxu0 %vm853_vm0, %v5849_v39  ;;  %4685 = vmatprep.mubr.msk.bf16.mxu1 %vm853_vm0, %v737_v2 }
 0x1fc   : > { %3546 = vst [vmem:[%s5845_s7 + $0xc] sm:$0xff] %v4321_v0  ;;  %v1572_v46 = vpop.f32.mrf.mxu1  ;;  %1338 = vmatprep.mubr.bf16.mxu0 %v6353_v63 }
 0x1fd   : > { %v1092_v9 = vpop.f32.mrf.mxu0  ;;  %v4515_v10 = vpack.c.bf16 %v1572_v46, %v1570_v18 }
 0x1fe   : > { %v4323_v37 = vpack.c.bf16 %v1092_v9, %v1090_v11  ;;  %v1574_v12 = vpop.f32.mrf.mxu1  ;;  %v754_v11 = vpop.trf.xlu1 }
 0x1ff   : > { %3740 = vst [vmem:[%s5845_s7 + $0x498] sm:$0xff] %v4515_v10  ;;  %v1094_v13 = vpop.f32.mrf.mxu0 }
 0x200   : > { %3548 = vst [vmem:[%s5845_s7 + $0x18] sm:$0xff] %v4323_v37  ;;  %v1576_v61 = vpop.f32.mrf.mxu1 }
 0x201   : > { %v1096_v15 = vpop.f32.mrf.mxu0  ;;  %v4517_v49 = vpack.c.bf16 %v1576_v61, %v1574_v12  ;;  %v765_v61 = vpop.trf.xlu0 }
 0x202   : > { %v4325_v1 = vpack.c.bf16 %v1096_v15, %v1094_v13  ;;  %v1580_v28 = vpop.f32.mrf.mxu1  ;;  %4686 = vmatmul.mubr.msk.bf16.gmra.mxu1 %vm853_vm0, %v738_v19 }
 0x203   : > { %3742 = vst [vmem:[%s5845_s7 + $0x4a4] sm:$0xff] %v4517_v49  ;;  %v1100_v25 = vpop.f32.mrf.mxu0  ;;  %3957 = vmatmul.mubr.msk.bf16.gmra.mxu0 %vm853_vm0, %v751_v4  ;;  %4689 = vmatprep.mubr.msk.bf16.mxu1 %vm853_vm0, %v739_v34 }
 0x204   : > { %3550 = vst [vmem:[%s5845_s7 + $0x24] sm:$0xff] %v4325_v1  ;;  %v1582_v20 = vpop.f32.mrf.mxu1  ;;  %1348 = vmatprep.mubr.bf16.mxu0 %v6353_v63 }
 0x205   : > { %v1102_v31 = vpop.f32.mrf.mxu0  ;;  %v4519_v21 = vpack.c.bf16 %v1582_v20, %v1580_v28  ;;  %v755_v20 = vpop.trf.xlu1 }
 0x206   : > { %v4327_v40 = vpack.c.bf16 %v1102_v31, %v1100_v25  ;;  %v1584_v41 = vpop.f32.mrf.mxu1 }
 0x207   : > { %3744 = vst [vmem:[%s5845_s7 + $0x4b0] sm:$0xff] %v4519_v21  ;;  %v1104_v36 = vpop.f32.mrf.mxu0 }
 0x208   : > { %3552 = vst [vmem:[%s5845_s7 + $0x30] sm:$0xff] %v4327_v40  ;;  %v1586_v26 = vpop.f32.mrf.mxu1 }
 0x209   : > { %v1106_v57 = vpop.f32.mrf.mxu0  ;;  %v4521_v54 = vpack.c.bf16 %v1586_v26, %v1584_v41 }
 0x20a   : > { %v4329_v3 = vpack.c.bf16 %v1106_v57, %v1104_v36  ;;  %v1590_v23 = vpop.f32.mrf.mxu1  ;;  %4690 = vmatmul.mubr.msk.bf16.gmra.mxu1 %vm853_vm0, %v5830_v5  ;;  %v5896_v36 = vpop.trf.xlu0 }
 0x20b   : > { %3746 = vst [vmem:[%s5845_s7 + $0x4bc] sm:$0xff] %v4521_v54  ;;  %v1110_v27 = vpop.f32.mrf.mxu0  ;;  %3958 = vmatmul.mubr.msk.bf16.gmra.mxu0 %vm853_vm0, %v752_v45  ;;  %4693 = vmatprep.mubr.msk.bf16.mxu1 %vm853_vm0, %v5837_v7 }
 0x20c   : > { %3554 = vst [vmem:[%s5845_s7 + $0x3c] sm:$0xff] %v4329_v3  ;;  %v1592_v62 = vpop.f32.mrf.mxu1  ;;  %1358 = vmatprep.mubr.bf16.mxu0 %v6353_v63 }
 0x20d   : > { %v1112_v2 = vpop.f32.mrf.mxu0  ;;  %v4523_v19 = vpack.c.bf16 %v1592_v62, %v1590_v23  ;;  %v756_v62 = vpop.trf.xlu1 }
 0x20e   : > { %v4331_v34 = vpack.c.bf16 %v1112_v2, %v1110_v27  ;;  %v1594_v16 = vpop.f32.mrf.mxu1 }
 0x20f   : > { %3748 = vst [vmem:[%s5845_s7 + $0x4c8] sm:$0xff] %v4523_v19  ;;  %v1114_v42 = vpop.f32.mrf.mxu0  ;;  %v5905_v19 = vpop.trf.xlu0 }
 0x210   : > { %3556 = vst [vmem:[%s5845_s7 + $0x48] sm:$0xff] %v4331_v34  ;;  %v1596_v5 = vpop.f32.mrf.mxu1 }
 0x211   : > { %v1116_v32 = vpop.f32.mrf.mxu0  ;;  %v4525_v38 = vpack.c.bf16 %v1596_v5, %v1594_v16 }
 0x212   : > { %v4333_v52 = vpack.c.bf16 %v1116_v32, %v1114_v42  ;;  %v1600_v7 = vpop.f32.mrf.mxu1  ;;  %4694 = vmatmul.mubr.msk.bf16.gmra.mxu1 %vm853_vm0, %v5849_v39 }
 0x213   : > { %3750 = vst [vmem:[%s5845_s7 + $0x4d4] sm:$0xff] %v4525_v38  ;;  %v1120_v56 = vpop.f32.mrf.mxu0  ;;  %3959 = vmatmul.mubr.msk.bf16.gmra.mxu0 %vm853_vm0, %v753_v29  ;;  %4697 = vmatprep.mubr.msk.bf16.mxu1 %vm853_vm0, %v751_v4 }
 0x214   : > { %3558 = vst [vmem:[%s5845_s7 + $0x54] sm:$0xff] %v4333_v52  ;;  %v1602_v17 = vpop.f32.mrf.mxu1  ;;  %1368 = vmatprep.mubr.bf16.mxu0 %v6353_v63 }
 0x215   : > { %v1122_v33 = vpop.f32.mrf.mxu0  ;;  %v4527_v48 = vpack.c.bf16 %v1602_v17, %v1600_v7  ;;  %v5913_v17 = vpop.trf.xlu0 }
 0x216   : > { %v4335_v43 = vpack.c.bf16 %v1122_v33, %v1120_v56  ;;  %v1604_v0 = vpop.f32.mrf.mxu1 }
 0x217   : > { %3752 = vst [vmem:[%s5845_s7 + $0x4e0] sm:$0xff] %v4527_v48  ;;  %v1124_v18 = vpop.f32.mrf.mxu0 }
 0x218   : > { %3560 = vst [vmem:[%s5845_s7 + $0x60] sm:$0xff] %v4335_v43  ;;  %v1606_v39 = vpop.f32.mrf.mxu1 }
 0x219   : > { %v1126_v46 = vpop.f32.mrf.mxu0  ;;  %v4529_v9 = vpack.c.bf16 %v1606_v39, %v1604_v0 }
 0x21a   : > { %v4337_v10 = vpack.c.bf16 %v1126_v46, %v1124_v18  ;;  %v1610_v37 = vpop.f32.mrf.mxu1  ;;  %4698 = vmatmul.mubr.msk.bf16.gmra.mxu1 %vm853_vm0, %v752_v45 }
 0x21b   : > { %3754 = vst [vmem:[%s5845_s7 + $0x4ec] sm:$0xff] %v4529_v9  ;;  %v1130_v12 = vpop.f32.mrf.mxu0  ;;  %3960 = vmatmul.mubr.msk.bf16.gmra.mxu0 %vm853_vm0, %v754_v11  ;;  %4701 = vmatprep.mubr.msk.bf16.mxu1 %vm853_vm0, %v753_v29  ;;  %v5925_v9 = vpop.trf.xlu0 }
 0x21c   : > { %3562 = vst [vmem:[%s5845_s7 + $0x6c] sm:$0xff] %v4337_v10  ;;  %v1612_v13 = vpop.f32.mrf.mxu1  ;;  %1378 = vmatprep.mubr.bf16.mxu0 %v6353_v63 }
 0x21d   : > { %v1132_v4 = vpop.f32.mrf.mxu0  ;;  %v4531_v15 = vpack.c.bf16 %v1612_v13, %v1610_v37 }
 0x21e   : > { %v4339_v49 = vpack.c.bf16 %v1132_v4, %v1130_v12  ;;  %v1614_v1 = vpop.f32.mrf.mxu1 }
 0x21f   : > { %3756 = vst [vmem:[%s5845_s7 + $0x4f8] sm:$0xff] %v4531_v15  ;;  %v1134_v28 = vpop.f32.mrf.mxu0 }
 0x220   : > { %3564 = vst [vmem:[%s5845_s7 + $0x78] sm:$0xff] %v4339_v49  ;;  %v1616_v25 = vpop.f32.mrf.mxu1 }
 0x221   : > { %v1136_v31 = vpop.f32.mrf.mxu0  ;;  %v4533_v21 = vpack.c.bf16 %v1616_v25, %v1614_v1  ;;  %v5931_v25 = vpop.trf.xlu0 }
 0x222   : > { %v4341_v40 = vpack.c.bf16 %v1136_v31, %v1134_v28  ;;  %v1620_v41 = vpop.f32.mrf.mxu1  ;;  %4702 = vmatmul.mubr.msk.bf16.gmra.mxu1 %vm853_vm0, %v754_v11 }
 0x223   : > { %3758 = vst [vmem:[%s5845_s7 + $0x504] sm:$0xff] %v4533_v21  ;;  %v1140_v26 = vpop.f32.mrf.mxu0  ;;  %3961 = vmatmul.mubr.msk.bf16.gmra.mxu0 %vm853_vm0, %v755_v20  ;;  %4705 = vmatprep.mubr.msk.bf16.mxu1 %vm853_vm0, %v755_v20  ;;  %v5940_v21 = vpop.trf.xlu1 }
 0x224   : > { %3566 = vst [vmem:[%s5845_s7 + $0x84] sm:$0xff] %v4341_v40  ;;  %v1622_v45 = vpop.f32.mrf.mxu1  ;;  %1388 = vmatprep.mubr.bf16.mxu0 %v6353_v63 }
 0x225   : > { %v1142_v57 = vpop.f32.mrf.mxu0  ;;  %v4535_v54 = vpack.c.bf16 %v1622_v45, %v1620_v41 }
 0x226   : > { %v4343_v3 = vpack.c.bf16 %v1142_v57, %v1140_v26  ;;  %v1624_v23 = vpop.f32.mrf.mxu1 }
 0x227   : > { %3760 = vst [vmem:[%s5845_s7 + $0x510] sm:$0xff] %v4535_v54  ;;  %v1144_v27 = vpop.f32.mrf.mxu0 }
 0x228   : > { %3568 = vst [vmem:[%s5845_s7 + $0x90] sm:$0xff] %v4343_v3  ;;  %v1626_v2 = vpop.f32.mrf.mxu1 }
 0x229   : > { %v1146_v34 = vpop.f32.mrf.mxu0  ;;  %v4537_v16 = vpack.c.bf16 %v1626_v2, %v1624_v23  ;;  %v5948_v2 = vpop.trf.xlu1 }
 0x22a   : > { %v4345_v42 = vpack.c.bf16 %v1146_v34, %v1144_v27  ;;  %v1630_v5 = vpop.f32.mrf.mxu1  ;;  %4706 = vmatmul.mubr.msk.bf16.gmra.mxu1 %vm853_vm0, %v756_v62 }
 0x22b   : > { %3762 = vst [vmem:[%s5845_s7 + $0x51c] sm:$0xff] %v4537_v16  ;;  %v1150_v29 = vpop.f32.mrf.mxu0  ;;  %3962 = vmatmul.mubr.msk.bf16.gmra.mxu0 %vm853_vm0, %v756_v62  ;;  %4709 = vmatprep.mubr.msk.bf16.mxu1 %vm853_vm0, %v765_v61 }
 0x22c   : > { %3570 = vst [vmem:[%s5845_s7 + $0x9c] sm:$0xff] %v4345_v42  ;;  %v1632_v32 = vpop.f32.mrf.mxu1  ;;  %1398 = vmatprep.mubr.bf16.mxu0 %v6353_v63 }
 0x22d   : > { %v1152_v38 = vpop.f32.mrf.mxu0  ;;  %v4539_v52 = vpack.c.bf16 %v1632_v32, %v1630_v5 }
 0x22e   : > { %v4347_v7 = vpack.c.bf16 %v1152_v38, %v1150_v29  ;;  %v1634_v56 = vpop.f32.mrf.mxu1 }
 0x22f   : > { %3764 = vst [vmem:[%s5845_s7 + $0x528] sm:$0xff] %v4539_v52  ;;  %v1154_v33 = vpop.f32.mrf.mxu0 }
 0x230   : > { %3572 = vst [vmem:[%s5845_s7 + $0xa8] sm:$0xff] %v4347_v7  ;;  %v1636_v48 = vpop.f32.mrf.mxu1 }
 0x231   : > { %v1156_v43 = vpop.f32.mrf.mxu0  ;;  %v4541_v0 = vpack.c.bf16 %v1636_v48, %v1634_v56 }
 0x232   : > { %v4349_v18 = vpack.c.bf16 %v1156_v43, %v1154_v33  ;;  %v1640_v39 = vpop.f32.mrf.mxu1  ;;  %4710 = vmatmul.mubr.msk.bf16.gmra.mxu1 %vm853_vm0, %v5896_v36 }
 0x233   : > { %3766 = vst [vmem:[%s5845_s7 + $0x534] sm:$0xff] %v4541_v0  ;;  %v1160_v11 = vpop.f32.mrf.mxu0  ;;  %3963 = vmatmul.mubr.msk.bf16.gmra.mxu0 %vm853_vm0, %v765_v61  ;;  %4713 = vmatprep.mubr.msk.bf16.mxu1 %vm853_vm0, %v5905_v19 }
 0x234   : > { %3574 = vst [vmem:[%s5845_s7 + $0xb4] sm:$0xff] %v4349_v18  ;;  %v1642_v46 = vpop.f32.mrf.mxu1  ;;  %1408 = vmatprep.mubr.bf16.mxu0 %v6353_v63 }
 0x235   : > { %v1162_v10 = vpop.f32.mrf.mxu0  ;;  %v4543_v37 = vpack.c.bf16 %v1642_v46, %v1640_v39 }
 0x236   : > { %v4351_v12 = vpack.c.bf16 %v1162_v10, %v1160_v11  ;;  %v1644_v13 = vpop.f32.mrf.mxu1 }
 0x237   : > { %3768 = vst [vmem:[%s5845_s7 + $0x540] sm:$0xff] %v4543_v37  ;;  %v1164_v4 = vpop.f32.mrf.mxu0 }
 0x238   : > { %3576 = vst [vmem:[%s5845_s7 + $0xc0] sm:$0xff] %v4351_v12  ;;  %v1646_v15 = vpop.f32.mrf.mxu1 }
 0x239   : > { %v1166_v61 = vpop.f32.mrf.mxu0  ;;  %v4545_v49 = vpack.c.bf16 %v1646_v15, %v1644_v13 }
 0x23a   : > { %v4353_v1 = vpack.c.bf16 %v1166_v61, %v1164_v4  ;;  %v1650_v28 = vpop.f32.mrf.mxu1  ;;  %4714 = vmatmul.mubr.msk.bf16.gmra.mxu1 %vm853_vm0, %v5913_v17 }
 0x23b   : > { %3770 = vst [vmem:[%s5845_s7 + $0x54c] sm:$0xff] %v4545_v49  ;;  %v1170_v20 = vpop.f32.mrf.mxu0  ;;  %3964 = vmatmul.mubr.msk.bf16.gmra.mxu0 %vm853_vm0, %v5896_v36  ;;  %4717 = vmatprep.mubr.msk.bf16.mxu1 %vm853_vm0, %v5925_v9  ;;  %v5944_v36 = vpop.trf.xlu0 }
 0x23c   : > { %3578 = vst [vmem:[%s5845_s7 + $0xcc] sm:$0xff] %v4353_v1  ;;  %v1652_v31 = vpop.f32.mrf.mxu1  ;;  %1418 = vmatprep.mubr.bf16.mxu0 %v6353_v63 }
 0x23d   : > { %v1172_v40 = vpop.f32.mrf.mxu0  ;;  %v4547_v41 = vpack.c.bf16 %v1652_v31, %v1650_v28 }
 0x23e   : > { %v4355_v26 = vpack.c.bf16 %v1172_v40, %v1170_v20  ;;  %v1654_v45 = vpop.f32.mrf.mxu1 }
 0x23f   : > { %3772 = vst [vmem:[%s5845_s7 + $0x558] sm:$0xff] %v4547_v41  ;;  %v1174_v57 = vpop.f32.mrf.mxu0  ;;  %v5958_v52 = vpop.trf.xlu0 }
 0x240   : > { %3580 = vst [vmem:[%s5845_s7 + $0xd8] sm:$0xff] %v4355_v26  ;;  %v1656_v54 = vpop.f32.mrf.mxu1 }
 0x241   : > { %v1176_v3 = vpop.f32.mrf.mxu0  ;;  %v4549_v23 = vpack.c.bf16 %v1656_v54, %v1654_v45 }
 0x242   : > { %v4357_v27 = vpack.c.bf16 %v1176_v3, %v1174_v57  ;;  %v1660_v62 = vpop.f32.mrf.mxu1  ;;  %4718 = vmatmul.mubr.msk.bf16.gmra.mxu1 %vm853_vm0, %v5931_v25 }
 0x243   : > { %3774 = vst [vmem:[%s5845_s7 + $0x564] sm:$0xff] %v4549_v23  ;;  %v1180_v34 = vpop.f32.mrf.mxu0  ;;  %3965 = vmatmul.mubr.msk.bf16.gmra.mxu0 %vm853_vm0, %v5905_v19  ;;  %4721 = vmatprep.mubr.msk.bf16.mxu1 %vm853_vm0, %v5944_v36  ;;  %v5961_v19 = vpop.trf.xlu1 }
 0x244   : > { %3582 = vst [vmem:[%s5845_s7 + $0xe4] sm:$0xff] %v4357_v27  ;;  %v1662_v16 = vpop.f32.mrf.mxu1  ;;  %1428 = vmatprep.mubr.bf16.mxu0 %v6353_v63 }
 0x245   : > { %v1182_v42 = vpop.f32.mrf.mxu0  ;;  %v4551_v5 = vpack.c.bf16 %v1662_v16, %v1660_v62 }
 0x246   : > { %v4359_v29 = vpack.c.bf16 %v1182_v42, %v1180_v34  ;;  %v1664_v32 = vpop.f32.mrf.mxu1 }
 0x247   : > { %3776 = vst [vmem:[%s5845_s7 + $0x570] sm:$0xff] %v4551_v5  ;;  %v1184_v38 = vpop.f32.mrf.mxu0  ;;  %v5972_v37 = vpop.trf.xlu1 }
 0x248   : > { %3584 = vst [vmem:[%s5845_s7 + $0xf0] sm:$0xff] %v4359_v29  ;;  %v1666_v7 = vpop.f32.mrf.mxu1 }
 0x249   : > { %v1186_v56 = vpop.f32.mrf.mxu0  ;;  %v4553_v33 = vpack.c.bf16 %v1666_v7, %v1664_v32 }
 0x24a   : > { %v4361_v48 = vpack.c.bf16 %v1186_v56, %v1184_v38  ;;  %v1670_v43 = vpop.f32.mrf.mxu1  ;;  %4722 = vmatmul.mubr.msk.bf16.gmra.mxu1 %vm853_vm0, %v5958_v52 }
 0x24b   : > { %3778 = vst [vmem:[%s5845_s7 + $0x57c] sm:$0xff] %v4553_v33  ;;  %v1190_v0 = vpop.f32.mrf.mxu0  ;;  %3966 = vmatmul.mubr.msk.bf16.gmra.mxu0 %vm853_vm0, %v5913_v17  ;;  %4725 = vmatprep.mubr.msk.bf16.mxu1 %vm853_vm0, %v5940_v21  ;;  %v5985_v28 = vpop.trf.xlu1 }
 0x24c   : > { %3586 = vst [vmem:[%s5845_s7 + $0xfc] sm:$0xff] %v4361_v48  ;;  %v1672_v18 = vpop.f32.mrf.mxu1  ;;  %1438 = vmatprep.mubr.bf16.mxu0 %v6353_v63 }
 0x24d   : > { %v1192_v39 = vpop.f32.mrf.mxu0  ;;  %v4555_v11 = vpack.c.bf16 %v1672_v18, %v1670_v43 }
 0x24e   : > { %v4363_v46 = vpack.c.bf16 %v1192_v39, %v1190_v0  ;;  %v1674_v10 = vpop.f32.mrf.mxu1 }
 0x24f   : > { %3780 = vst [vmem:[%s5845_s7 + $0x588] sm:$0xff] %v4555_v11  ;;  %v1194_v12 = vpop.f32.mrf.mxu0  ;;  %v5991_v23 = vpop.trf.xlu1 }
 0x250   : > { %3588 = vst [vmem:[%s5845_s7 + $0x108] sm:$0xff] %v4363_v46  ;;  %v1676_v13 = vpop.f32.mrf.mxu1 }
 0x251   : > { %v1196_v17 = vpop.f32.mrf.mxu0  ;;  %v4557_v4 = vpack.c.bf16 %v1676_v13, %v1674_v10 }
 0x252   : > { %v4365_v15 = vpack.c.bf16 %v1196_v17, %v1194_v12  ;;  %v1680_v61 = vpop.f32.mrf.mxu1  ;;  %4726 = vmatmul.mubr.msk.bf16.gmra.mxu1 %vm853_vm0, %v5948_v2 }
 0x253   : > { %3782 = vst [vmem:[%s5845_s7 + $0x594] sm:$0xff] %v4557_v4  ;;  %v1200_v49 = vpop.f32.mrf.mxu0  ;;  %3967 = vmatmul.mubr.msk.bf16.gmra.mxu0 %vm853_vm0, %v5925_v9  ;;  %4729 = vmatprep.mubr.msk.bf16.mxu1 %vm853_vm0, %v5961_v19  ;;  %v6002_v38 = vpop.trf.xlu1 }
 0x254   : > { %3590 = vst [vmem:[%s5845_s7 + $0x114] sm:$0xff] %v4365_v15  ;;  %v1682_v1 = vpop.f32.mrf.mxu1  ;;  %1448 = vmatprep.mubr.bf16.mxu0 %v6353_v63 }
 0x255   : > { %v1202_v20 = vpop.f32.mrf.mxu0  ;;  %v4559_v31 = vpack.c.bf16 %v1682_v1, %v1680_v61 }
 0x256   : > { %v4367_v40 = vpack.c.bf16 %v1202_v20, %v1200_v49  ;;  %v1684_v41 = vpop.f32.mrf.mxu1 }
 0x257   : > { %3784 = vst [vmem:[%s5845_s7 + $0x5a0] sm:$0xff] %v4559_v31  ;;  %v1204_v26 = vpop.f32.mrf.mxu0  ;;  %v6014_v10 = vpop.trf.xlu1 }
 0x258   : > { %3592 = vst [vmem:[%s5845_s7 + $0x120] sm:$0xff] %v4367_v40  ;;  %v1686_v45 = vpop.f32.mrf.mxu1 }
 0x259   : > { %v1206_v9 = vpop.f32.mrf.mxu0  ;;  %v4561_v57 = vpack.c.bf16 %v1686_v45, %v1684_v41 }
 0x25a   : > { %v4369_v54 = vpack.c.bf16 %v1206_v9, %v1204_v26  ;;  %v1690_v3 = vpop.f32.mrf.mxu1  ;;  %4730 = vmatmul.mubr.msk.bf16.gmra.mxu1 %vm853_vm0, %v5972_v37 }
 0x25b   : > { %3786 = vst [vmem:[%s5845_s7 + $0x5ac] sm:$0xff] %v4561_v57  ;;  %v1210_v27 = vpop.f32.mrf.mxu0  ;;  %3968 = vmatmul.mubr.msk.bf16.gmra.mxu0 %vm853_vm0, %v5931_v25  ;;  %4733 = vmatprep.mubr.msk.bf16.mxu1 %vm853_vm0, %v5985_v28 }
 0x25c   : > { %3594 = vst [vmem:[%s5845_s7 + $0x12c] sm:$0xff] %v4369_v54  ;;  %v1692_v62 = vpop.f32.mrf.mxu1  ;;  %1458 = vmatprep.mubr.bf16.mxu0 %v6353_v63 }
 0x25d   : > { %v1212_v34 = vpop.f32.mrf.mxu0  ;;  %v4563_v16 = vpack.c.bf16 %v1692_v62, %v1690_v3 }
 0x25e   : > { %v4371_v42 = vpack.c.bf16 %v1212_v34, %v1210_v27  ;;  %v1694_v5 = vpop.f32.mrf.mxu1 }
 0x25f   : > { %3788 = vst [vmem:[%s5845_s7 + $0x5b8] sm:$0xff] %v4563_v16  ;;  %v1214_v29 = vpop.f32.mrf.mxu0 }
 0x260   : > { %3596 = vst [vmem:[%s5845_s7 + $0x138] sm:$0xff] %v4371_v42  ;;  %v1696_v32 = vpop.f32.mrf.mxu1 }
 0x261   : > { %v1216_v25 = vpop.f32.mrf.mxu0  ;;  %v4565_v7 = vpack.c.bf16 %v1696_v32, %v1694_v5 }
 0x262   : > { %v4373_v56 = vpack.c.bf16 %v1216_v25, %v1214_v29  ;;  %v1700_v33 = vpop.f32.mrf.mxu1  ;;  %4734 = vmatmul.mubr.msk.bf16.gmra.mxu1 %vm853_vm0, %v5991_v23 }
 0x263   : > { %3790 = vst [vmem:[%s5845_s7 + $0x5c4] sm:$0xff] %v4565_v7  ;;  %v1220_v48 = vpop.f32.mrf.mxu0  ;;  %3969 = vmatmul.mubr.msk.bf16.gmra.mxu0 %vm853_vm0, %v5944_v36  ;;  %4737 = vmatprep.mubr.msk.bf16.mxu1 %vm853_vm0, %v6002_v38 }
 0x264   : > { %3598 = vst [vmem:[%s5845_s7 + $0x144] sm:$0xff] %v4373_v56  ;;  %v1702_v43 = vpop.f32.mrf.mxu1  ;;  %1468 = vmatprep.mubr.bf16.mxu0 %v6353_v63 }
 0x265   : > { %v1222_v0 = vpop.f32.mrf.mxu0  ;;  %v4567_v18 = vpack.c.bf16 %v1702_v43, %v1700_v33 }
 0x266   : > { %v4375_v39 = vpack.c.bf16 %v1222_v0, %v1220_v48  ;;  %v1704_v11 = vpop.f32.mrf.mxu1 }
 0x267   : > { %3792 = vst [vmem:[%s5845_s7 + $0x5d0] sm:$0xff] %v4567_v18  ;;  %v1224_v46 = vpop.f32.mrf.mxu0 }
 0x268   : > { %3600 = vst [vmem:[%s5845_s7 + $0x150] sm:$0xff] %v4375_v39  ;;  %v1706_v12 = vpop.f32.mrf.mxu1 }
 0x269   : > { %v1226_v36 = vpop.f32.mrf.mxu0  ;;  %v4569_v13 = vpack.c.bf16 %v1706_v12, %v1704_v11 }
 0x26a   : > { %v4377_v17 = vpack.c.bf16 %v1226_v36, %v1224_v46  ;;  %v1710_v4 = vpop.f32.mrf.mxu1  ;;  %4738 = vmatmul.mubr.msk.bf16.gmra.mxu1 %vm853_vm0, %v6014_v10 }
 0x26b   : > { %3794 = vst [vmem:[%s5845_s7 + $0x5dc] sm:$0xff] %v4569_v13  ;;  %v1230_v15 = vpop.f32.mrf.mxu0  ;;  %3970 = vmatmul.mubr.msk.bf16.gmra.mxu0 %vm853_vm0, %v5958_v52  ;;  %4741 = vmatprep.mubr.msk.bf16.mxu1 %vm853_vm0, %v5653_v58 }
 0x26c   : > { %3602 = vst [vmem:[%s5845_s7 + $0x15c] sm:$0xff] %v4377_v17  ;;  %v1712_v61 = vpop.f32.mrf.mxu1  ;;  %1478 = vmatprep.mubr.bf16.mxu0 %v6353_v63 }
 0x26d   : > { %v1232_v49 = vpop.f32.mrf.mxu0  ;;  %v4571_v1 = vpack.c.bf16 %v1712_v61, %v1710_v4 }
 0x26e   : > { %v4379_v20 = vpack.c.bf16 %v1232_v49, %v1230_v15  ;;  %v1714_v31 = vpop.f32.mrf.mxu1 }
 0x26f   : > { %3796 = vst [vmem:[%s5845_s7 + $0x5e8] sm:$0xff] %v4571_v1  ;;  %v1234_v40 = vpop.f32.mrf.mxu0 }
 0x270   : > { %3604 = vst [vmem:[%s5845_s7 + $0x168] sm:$0xff] %v4379_v20  ;;  %v1716_v41 = vpop.f32.mrf.mxu1 }
 0x271   : > { %v1236_v26 = vpop.f32.mrf.mxu0  ;;  %v4573_v52 = vpack.c.bf16 %v1716_v41, %v1714_v31 }
 0x272   : > { %v4381_v45 = vpack.c.bf16 %v1236_v26, %v1234_v40  ;;  %v4647_v58 = vpop.f32.mrf.mxu1  ;;  %4742 = vmatmul.mubr.msk.bf16.gmra.mxu1 %vm853_vm0, %v5664_v47 }
 0x273   : > { %3798 = vst [vmem:[%s5845_s7 + $0x5f4] sm:$0xff] %v4573_v52  ;;  %v1240_v9 = vpop.f32.mrf.mxu0  ;;  %3971 = vmatmul.mubr.msk.bf16.gmra.mxu0 %vm853_vm0, %v5940_v21  ;;  %v4324_v57 = vpack.c.bf16 %v4647_v58, %v4647_v58  ;;  %4745 = vmatprep.mubr.msk.bf16.mxu1 %vm853_vm0, %v5674_v55 }
 0x274   : > { %3606 = vst [vmem:[%s5845_s7 + $0x174] sm:$0xff] %v4381_v45  ;;  %v1753_v54 = vpop.f32.mrf.mxu1  ;;  %1488 = vmatprep.mubr.bf16.mxu0 %v6353_v63 }
 0x275   : > { %3549 = vst [vmem:[%s5845_s7 + $0x20] sm:$0xf] %v4324_v57  ;;  %v1242_v3 = vpop.f32.mrf.mxu0  ;;  %v4320_v27 = vpack.c.bf16 %v1753_v54, %v1753_v54 }
 0x276   : > { %v4383_v47 = vpack.c.bf16 %v1242_v3, %v1240_v9  ;;  %v4648_v62 = vpop.f32.mrf.mxu1 }
 0x277   : > { %3545 = vst [vmem:[%s5845_s7 + $0x8] sm:$0xf] %v4320_v27  ;;  %v1244_v34 = vpop.f32.mrf.mxu0  ;;  %v4326_v16 = vpack.c.bf16 %v4648_v62, %v4648_v62 }
 0x278   : > { %3608 = vst [vmem:[%s5845_s7 + $0x180] sm:$0xff] %v4383_v47  ;;  %v1756_v21 = vpop.f32.mrf.mxu1 }
 0x279   : > { %3551 = vst [vmem:[%s5845_s7 + $0x2c] sm:$0xf] %v4326_v16  ;;  %v1246_v42 = vpop.f32.mrf.mxu0  ;;  %v4322_v55 = vpack.c.bf16 %v1756_v21, %v1756_v21 }
 0x27a   : > { %v4385_v5 = vpack.c.bf16 %v1246_v42, %v1244_v34  ;;  %v4651_v29 = vpop.f32.mrf.mxu1  ;;  %4746 = vmatmul.mubr.msk.bf16.gmra.mxu1 %vm853_vm0, %v5684_v51 }
 0x27b   : > { %3547 = vst [vmem:[%s5845_s7 + $0x14] sm:$0xf] %v4322_v55  ;;  %v1250_v32 = vpop.f32.mrf.mxu0  ;;  %3972 = vmatmul.mubr.msk.bf16.gmra.mxu0 %vm853_vm0, %v5948_v2  ;;  %v4332_v25 = vpack.c.bf16 %v4651_v29, %v4651_v29  ;;  %4749 = vmatprep.mubr.msk.bf16.mxu1 %vm853_vm0, %v5694_v8 }
 0x27c   : > { %3610 = vst [vmem:[%s5845_s7 + $0x18c] sm:$0xff] %v4385_v5  ;;  %v1769_v7 = vpop.f32.mrf.mxu1  ;;  %1498 = vmatprep.mubr.bf16.mxu0 %v6353_v63 }
 0x27d   : > { %3557 = vst [vmem:[%s5845_s7 + $0x50] sm:$0xf] %v4332_v25  ;;  %v1252_v56 = vpop.f32.mrf.mxu0  ;;  %v4328_v33 = vpack.c.bf16 %v1769_v7, %v1769_v7 }
 0x27e   : > { %v4387_v51 = vpack.c.bf16 %v1252_v56, %v1250_v32  ;;  %v4652_v48 = vpop.f32.mrf.mxu1 }
 0x27f   : > { %3553 = vst [vmem:[%s5845_s7 + $0x38] sm:$0xf] %v4328_v33  ;;  %v1254_v43 = vpop.f32.mrf.mxu0  ;;  %v4334_v0 = vpack.c.bf16 %v4652_v48, %v4652_v48 }
 0x280   : > { %3612 = vst [vmem:[%s5845_s7 + $0x198] sm:$0xff] %v4387_v51  ;;  %v1772_v2 = vpop.f32.mrf.mxu1 }
 0x281   : > { %3559 = vst [vmem:[%s5845_s7 + $0x5c] sm:$0xf] %v4334_v0  ;;  %v1256_v18 = vpop.f32.mrf.mxu0  ;;  %v4330_v8 = vpack.c.bf16 %v1772_v2, %v1772_v2 }
 0x282   : > { %v4389_v39 = vpack.c.bf16 %v1256_v18, %v1254_v43  ;;  %v4655_v11 = vpop.f32.mrf.mxu1  ;;  %4750 = vmatmul.mubr.msk.bf16.gmra.mxu1 %vm853_vm0, %v5704_v22 }
 0x283   : > { %3555 = vst [vmem:[%s5845_s7 + $0x44] sm:$0xf] %v4330_v8  ;;  %v1260_v46 = vpop.f32.mrf.mxu0  ;;  %3973 = vmatmul.mubr.msk.bf16.gmra.mxu0 %vm853_vm0, %v5961_v19  ;;  %v4340_v12 = vpack.c.bf16 %v4655_v11, %v4655_v11  ;;  %4753 = vmatprep.mubr.msk.bf16.mxu1 %vm853_vm0, %v5714_v44 }
 0x284   : > { %3614 = vst [vmem:[%s5845_s7 + $0x1a4] sm:$0xff] %v4389_v39  ;;  %v1785_v36 = vpop.f32.mrf.mxu1  ;;  %1508 = vmatprep.mubr.bf16.mxu0 %v6353_v63 }
 0x285   : > { %3565 = vst [vmem:[%s5845_s7 + $0x80] sm:$0xf] %v4340_v12  ;;  %v1262_v13 = vpop.f32.mrf.mxu0  ;;  %v4336_v17 = vpack.c.bf16 %v1785_v36, %v1785_v36 }
 0x286   : > { %v4391_v22 = vpack.c.bf16 %v1262_v13, %v1260_v46  ;;  %v4656_v4 = vpop.f32.mrf.mxu1 }
 0x287   : > { %3561 = vst [vmem:[%s5845_s7 + $0x68] sm:$0xf] %v4336_v17  ;;  %v1264_v15 = vpop.f32.mrf.mxu0  ;;  %v4342_v61 = vpack.c.bf16 %v4656_v4, %v4656_v4 }
 0x288   : > { %3616 = vst [vmem:[%s5845_s7 + $0x1b0] sm:$0xff] %v4391_v22  ;;  %v1788_v19 = vpop.f32.mrf.mxu1 }
 0x289   : > { %3567 = vst [vmem:[%s5845_s7 + $0x8c] sm:$0xf] %v4342_v61  ;;  %v1266_v49 = vpop.f32.mrf.mxu0  ;;  %v4338_v44 = vpack.c.bf16 %v1788_v19, %v1788_v19 }
 0x28a   : > { %v4393_v1 = vpack.c.bf16 %v1266_v49, %v1264_v15  ;;  %v4659_v20 = vpop.f32.mrf.mxu1  ;;  %4754 = vmatmul.mubr.msk.bf16.gmra.mxu1 %vm853_vm0, %v5724_v50 }
 0x28b   : > { %3563 = vst [vmem:[%s5845_s7 + $0x74] sm:$0xf] %v4338_v44  ;;  %v1270_v31 = vpop.f32.mrf.mxu0  ;;  %3974 = vmatmul.mubr.msk.bf16.gmra.mxu0 %vm853_vm0, %v5972_v37  ;;  %v4348_v40 = vpack.c.bf16 %v4659_v20, %v4659_v20  ;;  %4757 = vmatprep.mubr.msk.bf16.mxu1 %vm853_vm0, %v5734_v59 }
 0x28c   : > { %3618 = vst [vmem:[%s5845_s7 + $0x1bc] sm:$0xff] %v4393_v1  ;;  %v1801_v41 = vpop.f32.mrf.mxu1  ;;  %1518 = vmatprep.mubr.bf16.mxu0 %v6353_v63 }
 0x28d   : > { %3573 = vst [vmem:[%s5845_s7 + $0xb0] sm:$0xf] %v4348_v40  ;;  %v1272_v26 = vpop.f32.mrf.mxu0  ;;  %v4344_v52 = vpack.c.bf16 %v1801_v41, %v1801_v41 }
 0x28e   : > { %v4395_v50 = vpack.c.bf16 %v1272_v26, %v1270_v31  ;;  %v4660_v45 = vpop.f32.mrf.mxu1 }
 0x28f   : > { %3569 = vst [vmem:[%s5845_s7 + $0x98] sm:$0xf] %v4344_v52  ;;  %v1274_v58 = vpop.f32.mrf.mxu0  ;;  %v4350_v9 = vpack.c.bf16 %v4660_v45, %v4660_v45 }
 0x290   : > { %3620 = vst [vmem:[%s5845_s7 + $0x1c8] sm:$0xff] %v4395_v50  ;;  %v1804_v37 = vpop.f32.mrf.mxu1 }
 0x291   : > { %3575 = vst [vmem:[%s5845_s7 + $0xbc] sm:$0xf] %v4350_v9  ;;  %v1276_v57 = vpop.f32.mrf.mxu0  ;;  %v4346_v59 = vpack.c.bf16 %v1804_v37, %v1804_v37 }
 0x292   : > { %v4397_v54 = vpack.c.bf16 %v1276_v57, %v1274_v58  ;;  %v4663_v3 = vpop.f32.mrf.mxu1  ;;  %4758 = vmatmul.mubr.msk.bf16.gmra.mxu1 %vm853_vm0, %v5744_v53 }
 0x293   : > { %3571 = vst [vmem:[%s5845_s7 + $0xa4] sm:$0xf] %v4346_v59  ;;  %v1280_v27 = vpop.f32.mrf.mxu0  ;;  %3975 = vmatmul.mubr.msk.bf16.gmra.mxu0 %vm853_vm0, %v5985_v28  ;;  %v4356_v47 = vpack.c.bf16 %v4663_v3, %v4663_v3  ;;  %4761 = vmatprep.mubr.msk.bf16.mxu1 %vm853_vm0, %v5751_v6 }
 0x294   : > { %3622 = vst [vmem:[%s5845_s7 + $0x1d4] sm:$0xff] %v4397_v54  ;;  %v1817_v62 = vpop.f32.mrf.mxu1  ;;  %1528 = vmatprep.mubr.bf16.mxu0 %v6353_v63 }
 0x295   : > { %3581 = vst [vmem:[%s5845_s7 + $0xe0] sm:$0xf] %v4356_v47  ;;  %v1282_v34 = vpop.f32.mrf.mxu0  ;;  %v4352_v16 = vpack.c.bf16 %v1817_v62, %v1817_v62 }
 0x296   : > { %v4399_v53 = vpack.c.bf16 %v1282_v34, %v1280_v27  ;;  %v4664_v21 = vpop.f32.mrf.mxu1 }
 0x297   : > { %3577 = vst [vmem:[%s5845_s7 + $0xc8] sm:$0xf] %v4352_v16  ;;  %v1284_v42 = vpop.f32.mrf.mxu0  ;;  %v4358_v55 = vpack.c.bf16 %v4664_v21, %v4664_v21 }
 0x298   : > { %3624 = vst [vmem:[%s5845_s7 + $0x1e0] sm:$0xff] %v4399_v53  ;;  %v1820_v28 = vpop.f32.mrf.mxu1 }
 0x299   : > { %3583 = vst [vmem:[%s5845_s7 + $0xec] sm:$0xf] %v4358_v55  ;;  %v1286_v5 = vpop.f32.mrf.mxu0  ;;  %v4354_v6 = vpack.c.bf16 %v1820_v28, %v1820_v28 }
 0x29a   : > { %v4401_v29 = vpack.c.bf16 %v1286_v5, %v1284_v42  ;;  %v4667_v32 = vpop.f32.mrf.mxu1  ;;  %4762 = vmatmul.mubr.msk.bf16.gmra.mxu1 %vm853_vm0, %v5758_v60 }
 0x29b   : > { %3579 = vst [vmem:[%s5845_s7 + $0xd4] sm:$0xf] %v4354_v6  ;;  %v1290_v25 = vpop.f32.mrf.mxu0  ;;  %3976 = vmatmul.mubr.msk.bf16.gmra.mxu0 %vm853_vm0, %v5991_v23  ;;  %v4364_v7 = vpack.c.bf16 %v4667_v32, %v4667_v32  ;;  %4765 = vmatprep.mubr.msk.bf16.mxu1 %vm853_vm0, %v5765_v14 }
 0x29c   : > { %3626 = vst [vmem:[%s5845_s7 + $0x1ec] sm:$0xff] %v4401_v29  ;;  %v1833_v56 = vpop.f32.mrf.mxu1  ;;  %1538 = vmatprep.mubr.bf16.mxu0 %v6353_v63 }
 0x29d   : > { %3589 = vst [vmem:[%s5845_s7 + $0x110] sm:$0xf] %v4364_v7  ;;  %v1292_v33 = vpop.f32.mrf.mxu0  ;;  %v4360_v51 = vpack.c.bf16 %v1833_v56, %v1833_v56 }
 0x29e   : > { %v4403_v60 = vpack.c.bf16 %v1292_v33, %v1290_v25  ;;  %v4668_v48 = vpop.f32.mrf.mxu1 }
 0x29f   : > { %3585 = vst [vmem:[%s5845_s7 + $0xf8] sm:$0xf] %v4360_v51  ;;  %v1294_v43 = vpop.f32.mrf.mxu0  ;;  %v4366_v0 = vpack.c.bf16 %v4668_v48, %v4668_v48 }
 0x2a0   : > { %3628 = vst [vmem:[%s5845_s7 + $0x1f8] sm:$0xff] %v4403_v60  ;;  %v1836_v23 = vpop.f32.mrf.mxu1 }
 0x2a1   : > { %3591 = vst [vmem:[%s5845_s7 + $0x11c] sm:$0xf] %v4366_v0  ;;  %v1296_v2 = vpop.f32.mrf.mxu0  ;;  %v4362_v14 = vpack.c.bf16 %v1836_v23, %v1836_v23 }
 0x2a2   : > { %v4405_v18 = vpack.c.bf16 %v1296_v2, %v1294_v43  ;;  %v4671_v8 = vpop.f32.mrf.mxu1  ;;  %4766 = vmatmul.mubr.msk.bf16.gmra.mxu1 %vm853_vm0, %v5772_v35 }
 0x2a3   : > { %3587 = vst [vmem:[%s5845_s7 + $0x104] sm:$0xf] %v4362_v14  ;;  %v1300_v39 = vpop.f32.mrf.mxu0  ;;  %3977 = vmatmul.mubr.msk.bf16.gmra.mxu0 %vm853_vm0, %v6002_v38  ;;  %v4372_v11 = vpack.c.bf16 %v4671_v8, %v4671_v8  ;;  %4769 = vmatprep.mubr.msk.bf16.mxu1 %vm853_vm0, %v5779_v30 }
 0x2a4   : > { %3630 = vst [vmem:[%s5845_s7 + $0x204] sm:$0xff] %v4405_v18  ;;  %v1849_v46 = vpop.f32.mrf.mxu1  ;;  %1548 = vmatprep.mubr.bf16.mxu0 %v6353_v63 }
 0x2a5   : > { %3597 = vst [vmem:[%s5845_s7 + $0x140] sm:$0xf] %v4372_v11  ;;  %v1302_v12 = vpop.f32.mrf.mxu0  ;;  %v4368_v36 = vpack.c.bf16 %v1849_v46, %v1849_v46 }
 0x2a6   : > { %v4407_v35 = vpack.c.bf16 %v1302_v12, %v1300_v39  ;;  %v4672_v13 = vpop.f32.mrf.mxu1 }
 0x2a7   : > { %3593 = vst [vmem:[%s5845_s7 + $0x128] sm:$0xf] %v4368_v36  ;;  %v1304_v17 = vpop.f32.mrf.mxu0  ;;  %v4374_v38 = vpack.c.bf16 %v4672_v13, %v4672_v13 }
 0x2a8   : > { %3632 = vst [vmem:[%s5845_s7 + $0x210] sm:$0xff] %v4407_v35  ;;  %v1852_v22 = vpop.f32.mrf.mxu1 }
 0x2a9   : > { %3599 = vst [vmem:[%s5845_s7 + $0x14c] sm:$0xf] %v4374_v38  ;;  %v1306_v4 = vpop.f32.mrf.mxu0  ;;  %v4370_v30 = vpack.c.bf16 %v1852_v22, %v1852_v22 }
 0x2aa   : > { %v4409_v15 = vpack.c.bf16 %v1306_v4, %v1304_v17  ;;  %v4675_v61 = vpop.f32.mrf.mxu1  ;;  %4770 = vmatmul.mubr.msk.bf16.gmra.mxu1 %vm853_vm0, %v5786_v24 }
 0x2ab   : > { %3595 = vst [vmem:[%s5845_s7 + $0x134] sm:$0xf] %v4370_v30  ;;  %v1310_v63 = vpop.f32.mrf.mxu0  ;;  %3978 = vmatmul.mubr.msk.bf16.gmra.mxu0 %vm853_vm0, %v6014_v10  ;;  %v4380_v19 = vpack.c.bf16 %v4675_v61, %v4675_v61 }
 0x2ac   : > { %3634 = vst [vmem:[%s5845_s7 + $0x21c] sm:$0xff] %v4409_v15  ;;  %v1865_v49 = vpop.f32.mrf.mxu1 }
 0x2ad   : > { %3605 = vst [vmem:[%s5845_s7 + $0x170] sm:$0xf] %v4380_v19  ;;  %v1312_v44 = vpop.f32.mrf.mxu0  ;;  %v4376_v1 = vpack.c.bf16 %v1865_v49, %v1865_v49 }
 0x2ae   : > { %v4411_v20 = vpack.c.bf16 %v1312_v44, %v1310_v63  ;;  %v4676_v31 = vpop.f32.mrf.mxu1 }
 0x2af   : > { %3601 = vst [vmem:[%s5845_s7 + $0x158] sm:$0xf] %v4376_v1  ;;  %v1314_v40 = vpop.f32.mrf.mxu0  ;;  %v4382_v24 = vpack.c.bf16 %v4676_v31, %v4676_v31 }
 0x2b0   : > { %3636 = vst [vmem:[%s5845_s7 + $0x228] sm:$0xff] %v4411_v20  ;;  %v1868_v41 = vpop.f32.mrf.mxu1 }
 0x2b1   : > { %3607 = vst [vmem:[%s5845_s7 + $0x17c] sm:$0xf] %v4382_v24  ;;  %v1316_v26 = vpop.f32.mrf.mxu0  ;;  %v4378_v10 = vpack.c.bf16 %v1868_v41, %v1868_v41 }
 0x2b2   : > { %v4413_v52 = vpack.c.bf16 %v1316_v26, %v1314_v40  ;;  %v4679_v50 = vpop.f32.mrf.mxu1 }
 0x2b3   : > { %3603 = vst [vmem:[%s5845_s7 + $0x164] sm:$0xf] %v4378_v10  ;;  %v1320_v45 = vpop.f32.mrf.mxu0  ;;  %v4388_v58 = vpack.c.bf16 %v4679_v50, %v4679_v50 }
 0x2b4   : > { %3638 = vst [vmem:[%s5845_s7 + $0x234] sm:$0xff] %v4413_v52  ;;  %v1881_v9 = vpop.f32.mrf.mxu1 }
 0x2b5   : > { %3613 = vst [vmem:[%s5845_s7 + $0x1a0] sm:$0xf] %v4388_v58  ;;  %v1322_v37 = vpop.f32.mrf.mxu0  ;;  %v4384_v57 = vpack.c.bf16 %v1881_v9, %v1881_v9 }
 0x2b6   : > { %v4415_v59 = vpack.c.bf16 %v1322_v37, %v1320_v45  ;;  %v4680_v54 = vpop.f32.mrf.mxu1 }
 0x2b7   : > { %3609 = vst [vmem:[%s5845_s7 + $0x188] sm:$0xf] %v4384_v57  ;;  %v1324_v3 = vpop.f32.mrf.mxu0  ;;  %v4390_v27 = vpack.c.bf16 %v4680_v54, %v4680_v54 }
 0x2b8   : > { %3640 = vst [vmem:[%s5845_s7 + $0x240] sm:$0xff] %v4415_v59  ;;  %v1884_v47 = vpop.f32.mrf.mxu1 }
 0x2b9   : > { %3615 = vst [vmem:[%s5845_s7 + $0x1ac] sm:$0xf] %v4390_v27  ;;  %v1326_v62 = vpop.f32.mrf.mxu0  ;;  %v4386_v34 = vpack.c.bf16 %v1884_v47, %v1884_v47 }
 0x2ba   : > { %v4417_v16 = vpack.c.bf16 %v1326_v62, %v1324_v3  ;;  %v4683_v53 = vpop.f32.mrf.mxu1 }
 0x2bb   : > { %3611 = vst [vmem:[%s5845_s7 + $0x194] sm:$0xf] %v4386_v34  ;;  %v1330_v21 = vpop.f32.mrf.mxu0  ;;  %v4396_v42 = vpack.c.bf16 %v4683_v53, %v4683_v53 }
 0x2bc   : > { %3642 = vst [vmem:[%s5845_s7 + $0x24c] sm:$0xff] %v4417_v16  ;;  %v1897_v55 = vpop.f32.mrf.mxu1 }
 0x2bd   : > { %3621 = vst [vmem:[%s5845_s7 + $0x1d0] sm:$0xf] %v4396_v42  ;;  %v1332_v28 = vpop.f32.mrf.mxu0  ;;  %v4392_v5 = vpack.c.bf16 %v1897_v55, %v1897_v55 }
 0x2be   : > { %v4419_v6 = vpack.c.bf16 %v1332_v28, %v1330_v21  ;;  %v4684_v29 = vpop.f32.mrf.mxu1 }
 0x2bf   : > { %3617 = vst [vmem:[%s5845_s7 + $0x1b8] sm:$0xf] %v4392_v5  ;;  %v1334_v32 = vpop.f32.mrf.mxu0  ;;  %v4398_v25 = vpack.c.bf16 %v4684_v29, %v4684_v29 }
 0x2c0   : > { %3644 = vst [vmem:[%s5845_s7 + $0x258] sm:$0xff] %v4419_v6  ;;  %v1900_v7 = vpop.f32.mrf.mxu1 }
 0x2c1   : > { %3623 = vst [vmem:[%s5845_s7 + $0x1dc] sm:$0xf] %v4398_v25  ;;  %v1336_v56 = vpop.f32.mrf.mxu0  ;;  %v4394_v33 = vpack.c.bf16 %v1900_v7, %v1900_v7 }
 0x2c2   : > { %v4421_v51 = vpack.c.bf16 %v1336_v56, %v1334_v32  ;;  %v4687_v60 = vpop.f32.mrf.mxu1 }
 0x2c3   : > { %3619 = vst [vmem:[%s5845_s7 + $0x1c4] sm:$0xf] %v4394_v33  ;;  %v1340_v48 = vpop.f32.mrf.mxu0  ;;  %v4404_v43 = vpack.c.bf16 %v4687_v60, %v4687_v60 }
 0x2c4   : > { %3646 = vst [vmem:[%s5845_s7 + $0x264] sm:$0xff] %v4421_v51  ;;  %v1913_v0 = vpop.f32.mrf.mxu1 }
 0x2c5   : > { %3629 = vst [vmem:[%s5845_s7 + $0x200] sm:$0xf] %v4404_v43  ;;  %v1342_v23 = vpop.f32.mrf.mxu0  ;;  %v4400_v2 = vpack.c.bf16 %v1913_v0, %v1913_v0 }
 0x2c6   : > { %v4423_v14 = vpack.c.bf16 %v1342_v23, %v1340_v48  ;;  %v4688_v18 = vpop.f32.mrf.mxu1 }
 0x2c7   : > { %3625 = vst [vmem:[%s5845_s7 + $0x1e8] sm:$0xf] %v4400_v2  ;;  %v1344_v8 = vpop.f32.mrf.mxu0  ;;  %v4406_v39 = vpack.c.bf16 %v4688_v18, %v4688_v18 }
 0x2c8   : > { %3648 = vst [vmem:[%s5845_s7 + $0x270] sm:$0xff] %v4423_v14  ;;  %v1916_v11 = vpop.f32.mrf.mxu1 }
 0x2c9   : > { %3631 = vst [vmem:[%s5845_s7 + $0x20c] sm:$0xf] %v4406_v39  ;;  %v1346_v46 = vpop.f32.mrf.mxu0  ;;  %v4402_v12 = vpack.c.bf16 %v1916_v11, %v1916_v11 }
 0x2ca   : > { %v4425_v36 = vpack.c.bf16 %v1346_v46, %v1344_v8  ;;  %v4691_v35 = vpop.f32.mrf.mxu1 }
 0x2cb   : > { %3627 = vst [vmem:[%s5845_s7 + $0x1f4] sm:$0xf] %v4402_v12  ;;  %v1350_v13 = vpop.f32.mrf.mxu0  ;;  %v4412_v17 = vpack.c.bf16 %v4691_v35, %v4691_v35 }
 0x2cc   : > { %3650 = vst [vmem:[%s5845_s7 + $0x27c] sm:$0xff] %v4425_v36  ;;  %v1929_v38 = vpop.f32.mrf.mxu1 }
 0x2cd   : > { %3637 = vst [vmem:[%s5845_s7 + $0x230] sm:$0xf] %v4412_v17  ;;  %v1352_v22 = vpop.f32.mrf.mxu0  ;;  %v4408_v4 = vpack.c.bf16 %v1929_v38, %v1929_v38 }
 0x2ce   : > { %v4427_v30 = vpack.c.bf16 %v1352_v22, %v1350_v13  ;;  %v4692_v15 = vpop.f32.mrf.mxu1 }
 0x2cf   : > { %3633 = vst [vmem:[%s5845_s7 + $0x218] sm:$0xf] %v4408_v4  ;;  %v1354_v61 = vpop.f32.mrf.mxu0  ;;  %v4414_v63 = vpack.c.bf16 %v4692_v15, %v4692_v15 }
 0x2d0   : > { %3652 = vst [vmem:[%s5845_s7 + $0x288] sm:$0xff] %v4427_v30  ;;  %v1932_v19 = vpop.f32.mrf.mxu1 }
 0x2d1   : > { %3639 = vst [vmem:[%s5845_s7 + $0x23c] sm:$0xf] %v4414_v63  ;;  %v1356_v49 = vpop.f32.mrf.mxu0  ;;  %v4410_v44 = vpack.c.bf16 %v1932_v19, %v1932_v19 }
 0x2d2   : > { %v4429_v1 = vpack.c.bf16 %v1356_v49, %v1354_v61  ;;  %v4695_v20 = vpop.f32.mrf.mxu1 }
 0x2d3   : > { %3635 = vst [vmem:[%s5845_s7 + $0x224] sm:$0xf] %v4410_v44  ;;  %v1360_v31 = vpop.f32.mrf.mxu0  ;;  %v4420_v40 = vpack.c.bf16 %v4695_v20, %v4695_v20 }
 0x2d4   : > { %3654 = vst [vmem:[%s5845_s7 + $0x294] sm:$0xff] %v4429_v1  ;;  %v1945_v24 = vpop.f32.mrf.mxu1 }
 0x2d5   : > { %3645 = vst [vmem:[%s5845_s7 + $0x260] sm:$0xf] %v4420_v40  ;;  %v1362_v41 = vpop.f32.mrf.mxu0  ;;  %v4416_v26 = vpack.c.bf16 %v1945_v24, %v1945_v24 }
 0x2d6   : > { %v4431_v10 = vpack.c.bf16 %v1362_v41, %v1360_v31  ;;  %v4696_v52 = vpop.f32.mrf.mxu1 }
 0x2d7   : > { %3641 = vst [vmem:[%s5845_s7 + $0x248] sm:$0xf] %v4416_v26  ;;  %v1364_v50 = vpop.f32.mrf.mxu0  ;;  %v4422_v45 = vpack.c.bf16 %v4696_v52, %v4696_v52 }
 0x2d8   : > { %3656 = vst [vmem:[%s5845_s7 + $0x2a0] sm:$0xff] %v4431_v10  ;;  %v1948_v58 = vpop.f32.mrf.mxu1 }
 0x2d9   : > { %3647 = vst [vmem:[%s5845_s7 + $0x26c] sm:$0xf] %v4422_v45  ;;  %v1366_v9 = vpop.f32.mrf.mxu0  ;;  %v4418_v37 = vpack.c.bf16 %v1948_v58, %v1948_v58 }
 0x2da   : > { %v4433_v57 = vpack.c.bf16 %v1366_v9, %v1364_v50  ;;  %v4699_v59 = vpop.f32.mrf.mxu1 }
 0x2db   : > { %3643 = vst [vmem:[%s5845_s7 + $0x254] sm:$0xf] %v4418_v37  ;;  %v1370_v54 = vpop.f32.mrf.mxu0  ;;  %v4428_v3 = vpack.c.bf16 %v4699_v59, %v4699_v59 }
 0x2dc   : > { %3658 = vst [vmem:[%s5845_s7 + $0x2ac] sm:$0xff] %v4433_v57  ;;  %v1961_v27 = vpop.f32.mrf.mxu1 }
 0x2dd   : > { %3653 = vst [vmem:[%s5845_s7 + $0x290] sm:$0xf] %v4428_v3  ;;  %v1372_v47 = vpop.f32.mrf.mxu0  ;;  %v4424_v62 = vpack.c.bf16 %v1961_v27, %v1961_v27 }
 0x2de   : > { %v4435_v34 = vpack.c.bf16 %v1372_v47, %v1370_v54  ;;  %v4700_v16 = vpop.f32.mrf.mxu1 }
 0x2df   : > { %3649 = vst [vmem:[%s5845_s7 + $0x278] sm:$0xf] %v4424_v62  ;;  %v1374_v53 = vpop.f32.mrf.mxu0  ;;  %v4430_v21 = vpack.c.bf16 %v4700_v16, %v4700_v16 }
 0x2e0   : > { %3660 = vst [vmem:[%s5845_s7 + $0x2b8] sm:$0xff] %v4435_v34  ;;  %v1964_v42 = vpop.f32.mrf.mxu1 }
 0x2e1   : > { %3655 = vst [vmem:[%s5845_s7 + $0x29c] sm:$0xf] %v4430_v21  ;;  %v1376_v55 = vpop.f32.mrf.mxu0  ;;  %v4426_v28 = vpack.c.bf16 %v1964_v42, %v1964_v42 }
 0x2e2   : > { %v4437_v5 = vpack.c.bf16 %v1376_v55, %v1374_v53  ;;  %v4703_v6 = vpop.f32.mrf.mxu1 }
 0x2e3   : > { %3651 = vst [vmem:[%s5845_s7 + $0x284] sm:$0xf] %v4426_v28  ;;  %v1380_v29 = vpop.f32.mrf.mxu0  ;;  %v4436_v32 = vpack.c.bf16 %v4703_v6, %v4703_v6 }
 0x2e4   : > { %3662 = vst [vmem:[%s5845_s7 + $0x2c4] sm:$0xff] %v4437_v5  ;;  %v1977_v25 = vpop.f32.mrf.mxu1 }
 0x2e5   : > { %3661 = vst [vmem:[%s5845_s7 + $0x2c0] sm:$0xf] %v4436_v32  ;;  %v1382_v7 = vpop.f32.mrf.mxu0  ;;  %v4432_v56 = vpack.c.bf16 %v1977_v25, %v1977_v25 }
 0x2e6   : > { %v4439_v33 = vpack.c.bf16 %v1382_v7, %v1380_v29  ;;  %v4704_v51 = vpop.f32.mrf.mxu1 }
 0x2e7   : > { %3657 = vst [vmem:[%s5845_s7 + $0x2a8] sm:$0xf] %v4432_v56  ;;  %v1384_v60 = vpop.f32.mrf.mxu0  ;;  %v4438_v48 = vpack.c.bf16 %v4704_v51, %v4704_v51 }
 0x2e8   : > { %3664 = vst [vmem:[%s5845_s7 + $0x2d0] sm:$0xff] %v4439_v33  ;;  %v1980_v43 = vpop.f32.mrf.mxu1 }
 0x2e9   : > { %3663 = vst [vmem:[%s5845_s7 + $0x2cc] sm:$0xf] %v4438_v48  ;;  %v1386_v0 = vpop.f32.mrf.mxu0  ;;  %v4434_v23 = vpack.c.bf16 %v1980_v43, %v1980_v43 }
 0x2ea   : > { %v4441_v2 = vpack.c.bf16 %v1386_v0, %v1384_v60  ;;  %v4707_v14 = vpop.f32.mrf.mxu1 }
 0x2eb   : > { %3659 = vst [vmem:[%s5845_s7 + $0x2b4] sm:$0xf] %v4434_v23  ;;  %v1390_v18 = vpop.f32.mrf.mxu0  ;;  %v4444_v8 = vpack.c.bf16 %v4707_v14, %v4707_v14 }
 0x2ec   : > { %3666 = vst [vmem:[%s5845_s7 + $0x2dc] sm:$0xff] %v4441_v2  ;;  %v1993_v39 = vpop.f32.mrf.mxu1 }
 0x2ed   : > { %3669 = vst [vmem:[%s5845_s7 + $0x2f0] sm:$0xf] %v4444_v8  ;;  %v1392_v11 = vpop.f32.mrf.mxu0  ;;  %v4440_v46 = vpack.c.bf16 %v1993_v39, %v1993_v39 }
 0x2ee   : > { %v4443_v12 = vpack.c.bf16 %v1392_v11, %v1390_v18  ;;  %v4708_v36 = vpop.f32.mrf.mxu1 }
 0x2ef   : > { %3665 = vst [vmem:[%s5845_s7 + $0x2d8] sm:$0xf] %v4440_v46  ;;  %v1394_v35 = vpop.f32.mrf.mxu0  ;;  %v4446_v13 = vpack.c.bf16 %v4708_v36, %v4708_v36 }
 0x2f0   : > { %3668 = vst [vmem:[%s5845_s7 + $0x2e8] sm:$0xff] %v4443_v12  ;;  %v1996_v17 = vpop.f32.mrf.mxu1 }
 0x2f1   : > { %3671 = vst [vmem:[%s5845_s7 + $0x2fc] sm:$0xf] %v4446_v13  ;;  %v1396_v38 = vpop.f32.mrf.mxu0  ;;  %v4442_v22 = vpack.c.bf16 %v1996_v17, %v1996_v17 }
 0x2f2   : > { %v4445_v4 = vpack.c.bf16 %v1396_v38, %v1394_v35  ;;  %v4711_v30 = vpop.f32.mrf.mxu1 }
 0x2f3   : > { %3667 = vst [vmem:[%s5845_s7 + $0x2e4] sm:$0xf] %v4442_v22  ;;  %v1400_v15 = vpop.f32.mrf.mxu0  ;;  %v4452_v61 = vpack.c.bf16 %v4711_v30, %v4711_v30 }
 0x2f4   : > { %3670 = vst [vmem:[%s5845_s7 + $0x2f4] sm:$0xff] %v4445_v4  ;;  %v2009_v63 = vpop.f32.mrf.mxu1 }
 0x2f5   : > { %3677 = vst [vmem:[%s5845_s7 + $0x320] sm:$0xf] %v4452_v61  ;;  %v1402_v19 = vpop.f32.mrf.mxu0  ;;  %v4448_v49 = vpack.c.bf16 %v2009_v63, %v2009_v63 }
 0x2f6   : > { %v4447_v44 = vpack.c.bf16 %v1402_v19, %v1400_v15  ;;  %v4712_v1 = vpop.f32.mrf.mxu1 }
 0x2f7   : > { %3673 = vst [vmem:[%s5845_s7 + $0x308] sm:$0xf] %v4448_v49  ;;  %v1404_v20 = vpop.f32.mrf.mxu0  ;;  %v4454_v31 = vpack.c.bf16 %v4712_v1, %v4712_v1 }
 0x2f8   : > { %3672 = vst [vmem:[%s5845_s7 + $0x300] sm:$0xff] %v4447_v44  ;;  %v2012_v40 = vpop.f32.mrf.mxu1 }
 0x2f9   : > { %3679 = vst [vmem:[%s5845_s7 + $0x32c] sm:$0xf] %v4454_v31  ;;  %v1406_v24 = vpop.f32.mrf.mxu0  ;;  %v4450_v41 = vpack.c.bf16 %v2012_v40, %v2012_v40 }
 0x2fa   : > { %v4449_v26 = vpack.c.bf16 %v1406_v24, %v1404_v20  ;;  %v4715_v10 = vpop.f32.mrf.mxu1 }
 0x2fb   : > { %3675 = vst [vmem:[%s5845_s7 + $0x314] sm:$0xf] %v4450_v41  ;;  %v1410_v52 = vpop.f32.mrf.mxu0  ;;  %v4460_v50 = vpack.c.bf16 %v4715_v10, %v4715_v10 }
 0x2fc   : > { %3674 = vst [vmem:[%s5845_s7 + $0x30c] sm:$0xff] %v4449_v26  ;;  %v2025_v45 = vpop.f32.mrf.mxu1 }
 0x2fd   : > { %3685 = vst [vmem:[%s5845_s7 + $0x350] sm:$0xf] %v4460_v50  ;;  %v1412_v58 = vpop.f32.mrf.mxu0  ;;  %v4456_v9 = vpack.c.bf16 %v2025_v45, %v2025_v45 }
 0x2fe   : > { %v4451_v37 = vpack.c.bf16 %v1412_v58, %v1410_v52  ;;  %v4716_v57 = vpop.f32.mrf.mxu1 }
 0x2ff   : > { %3681 = vst [vmem:[%s5845_s7 + $0x338] sm:$0xf] %v4456_v9  ;;  %v1414_v59 = vpop.f32.mrf.mxu0  ;;  %v4462_v54 = vpack.c.bf16 %v4716_v57, %v4716_v57 }
 0x300   : > { %3676 = vst [vmem:[%s5845_s7 + $0x318] sm:$0xff] %v4451_v37  ;;  %v2028_v3 = vpop.f32.mrf.mxu1 }
 0x301   : > { %3687 = vst [vmem:[%s5845_s7 + $0x35c] sm:$0xf] %v4462_v54  ;;  %v1416_v27 = vpop.f32.mrf.mxu0  ;;  %v4458_v47 = vpack.c.bf16 %v2028_v3, %v2028_v3 }
 0x302   : > { %v4453_v62 = vpack.c.bf16 %v1416_v27, %v1414_v59  ;;  %v4719_v34 = vpop.f32.mrf.mxu1 }
 0x303   : > { %3683 = vst [vmem:[%s5845_s7 + $0x344] sm:$0xf] %v4458_v47  ;;  %v1420_v16 = vpop.f32.mrf.mxu0  ;;  %v4468_v53 = vpack.c.bf16 %v4719_v34, %v4719_v34 }
 0x304   : > { %3678 = vst [vmem:[%s5845_s7 + $0x324] sm:$0xff] %v4453_v62  ;;  %v2041_v21 = vpop.f32.mrf.mxu1 }
 0x305   : > { %3693 = vst [vmem:[%s5845_s7 + $0x380] sm:$0xf] %v4468_v53  ;;  %v1422_v42 = vpop.f32.mrf.mxu0  ;;  %v4464_v55 = vpack.c.bf16 %v2041_v21, %v2041_v21 }
 0x306   : > { %v4455_v28 = vpack.c.bf16 %v1422_v42, %v1420_v16  ;;  %v4720_v5 = vpop.f32.mrf.mxu1 }
 0x307   : > { %3689 = vst [vmem:[%s5845_s7 + $0x368] sm:$0xf] %v4464_v55  ;;  %v1424_v6 = vpop.f32.mrf.mxu0  ;;  %v4470_v29 = vpack.c.bf16 %v4720_v5, %v4720_v5 }
 0x308   : > { %3680 = vst [vmem:[%s5845_s7 + $0x330] sm:$0xff] %v4455_v28  ;;  %v2044_v32 = vpop.f32.mrf.mxu1 }
 0x309   : > { %3695 = vst [vmem:[%s5845_s7 + $0x38c] sm:$0xf] %v4470_v29  ;;  %v1426_v25 = vpop.f32.mrf.mxu0  ;;  %v4466_v7 = vpack.c.bf16 %v2044_v32, %v2044_v32 }
 0x30a   : > { %v4457_v56 = vpack.c.bf16 %v1426_v25, %v1424_v6  ;;  %v4723_v33 = vpop.f32.mrf.mxu1 }
 0x30b   : > { %3691 = vst [vmem:[%s5845_s7 + $0x374] sm:$0xf] %v4466_v7  ;;  %v1430_v51 = vpop.f32.mrf.mxu0  ;;  %v4476_v60 = vpack.c.bf16 %v4723_v33, %v4723_v33 }
 0x30c   : > { %3682 = vst [vmem:[%s5845_s7 + $0x33c] sm:$0xff] %v4457_v56  ;;  %v2057_v48 = vpop.f32.mrf.mxu1 }
 0x30d   : > { %3701 = vst [vmem:[%s5845_s7 + $0x3b0] sm:$0xf] %v4476_v60  ;;  %v1432_v43 = vpop.f32.mrf.mxu0  ;;  %v4472_v0 = vpack.c.bf16 %v2057_v48, %v2057_v48 }
 0x30e   : > { %v4459_v23 = vpack.c.bf16 %v1432_v43, %v1430_v51  ;;  %v4724_v2 = vpop.f32.mrf.mxu1 }
 0x30f   : > { %3697 = vst [vmem:[%s5845_s7 + $0x398] sm:$0xf] %v4472_v0  ;;  %v1434_v14 = vpop.f32.mrf.mxu0  ;;  %v4478_v18 = vpack.c.bf16 %v4724_v2, %v4724_v2 }
 0x310   : > { %3684 = vst [vmem:[%s5845_s7 + $0x348] sm:$0xff] %v4459_v23  ;;  %v2060_v8 = vpop.f32.mrf.mxu1 }
 0x311   : > { %3703 = vst [vmem:[%s5845_s7 + $0x3bc] sm:$0xf] %v4478_v18  ;;  %v1436_v39 = vpop.f32.mrf.mxu0  ;;  %v4474_v11 = vpack.c.bf16 %v2060_v8, %v2060_v8 }
 0x312   : > { %v4461_v46 = vpack.c.bf16 %v1436_v39, %v1434_v14  ;;  %v4727_v12 = vpop.f32.mrf.mxu1 }
 0x313   : > { %3699 = vst [vmem:[%s5845_s7 + $0x3a4] sm:$0xf] %v4474_v11  ;;  %v1440_v36 = vpop.f32.mrf.mxu0  ;;  %v4484_v35 = vpack.c.bf16 %v4727_v12, %v4727_v12 }
 0x314   : > { %3686 = vst [vmem:[%s5845_s7 + $0x354] sm:$0xff] %v4461_v46  ;;  %v2073_v13 = vpop.f32.mrf.mxu1 }
 0x315   : > { %3709 = vst [vmem:[%s5845_s7 + $0x3e0] sm:$0xf] %v4484_v35  ;;  %v1442_v17 = vpop.f32.mrf.mxu0  ;;  %v4480_v38 = vpack.c.bf16 %v2073_v13, %v2073_v13 }
 0x316   : > { %v4463_v22 = vpack.c.bf16 %v1442_v17, %v1440_v36  ;;  %v4728_v4 = vpop.f32.mrf.mxu1 }
 0x317   : > { %3705 = vst [vmem:[%s5845_s7 + $0x3c8] sm:$0xf] %v4480_v38  ;;  %v1444_v30 = vpop.f32.mrf.mxu0  ;;  %v4486_v15 = vpack.c.bf16 %v4728_v4, %v4728_v4 }
 0x318   : > { %3688 = vst [vmem:[%s5845_s7 + $0x360] sm:$0xff] %v4463_v22  ;;  %v2076_v61 = vpop.f32.mrf.mxu1 }
 0x319   : > { %3711 = vst [vmem:[%s5845_s7 + $0x3ec] sm:$0xf] %v4486_v15  ;;  %v1446_v63 = vpop.f32.mrf.mxu0  ;;  %v4482_v19 = vpack.c.bf16 %v2076_v61, %v2076_v61 }
 0x31a   : > { %v4465_v49 = vpack.c.bf16 %v1446_v63, %v1444_v30  ;;  %v4731_v44 = vpop.f32.mrf.mxu1 }
 0x31b   : > { %3707 = vst [vmem:[%s5845_s7 + $0x3d4] sm:$0xf] %v4482_v19  ;;  %v1450_v1 = vpop.f32.mrf.mxu0  ;;  %v4492_v20 = vpack.c.bf16 %v4731_v44, %v4731_v44 }
 0x31c   : > { %3690 = vst [vmem:[%s5845_s7 + $0x36c] sm:$0xff] %v4465_v49  ;;  %v2089_v31 = vpop.f32.mrf.mxu1 }
 0x31d   : > { %3717 = vst [vmem:[%s5845_s7 + $0x410] sm:$0xf] %v4492_v20  ;;  %v1452_v40 = vpop.f32.mrf.mxu0  ;;  %v4488_v24 = vpack.c.bf16 %v2089_v31, %v2089_v31 }
 0x31e   : > { %v4467_v41 = vpack.c.bf16 %v1452_v40, %v1450_v1  ;;  %v4732_v26 = vpop.f32.mrf.mxu1 }
 0x31f   : > { %3713 = vst [vmem:[%s5845_s7 + $0x3f8] sm:$0xf] %v4488_v24  ;;  %v1454_v10 = vpop.f32.mrf.mxu0  ;;  %v4494_v52 = vpack.c.bf16 %v4732_v26, %v4732_v26 }
 0x320   : > { %3692 = vst [vmem:[%s5845_s7 + $0x378] sm:$0xff] %v4467_v41  ;;  %v2092_v50 = vpop.f32.mrf.mxu1 }
 0x321   : > { %3719 = vst [vmem:[%s5845_s7 + $0x41c] sm:$0xf] %v4494_v52  ;;  %v1456_v45 = vpop.f32.mrf.mxu0  ;;  %v4490_v58 = vpack.c.bf16 %v2092_v50, %v2092_v50 }
 0x322   : > { %v4469_v9 = vpack.c.bf16 %v1456_v45, %v1454_v10  ;;  %v4735_v37 = vpop.f32.mrf.mxu1 }
 0x323   : > { %3715 = vst [vmem:[%s5845_s7 + $0x404] sm:$0xf] %v4490_v58  ;;  %v1460_v57 = vpop.f32.mrf.mxu0  ;;  %v4500_v59 = vpack.c.bf16 %v4735_v37, %v4735_v37 }
 0x324   : > { %3694 = vst [vmem:[%s5845_s7 + $0x384] sm:$0xff] %v4469_v9  ;;  %v2105_v54 = vpop.f32.mrf.mxu1 }
 0x325   : > { %3725 = vst [vmem:[%s5845_s7 + $0x440] sm:$0xf] %v4500_v59  ;;  %v1462_v3 = vpop.f32.mrf.mxu0  ;;  %v4496_v27 = vpack.c.bf16 %v2105_v54, %v2105_v54 }
 0x326   : > { %v4471_v47 = vpack.c.bf16 %v1462_v3, %v1460_v57  ;;  %v4736_v62 = vpop.f32.mrf.mxu1 }
 0x327   : > { %3721 = vst [vmem:[%s5845_s7 + $0x428] sm:$0xf] %v4496_v27  ;;  %v1464_v34 = vpop.f32.mrf.mxu0  ;;  %v4502_v16 = vpack.c.bf16 %v4736_v62, %v4736_v62 }
 0x328   : > { %3696 = vst [vmem:[%s5845_s7 + $0x390] sm:$0xff] %v4471_v47  ;;  %v2108_v53 = vpop.f32.mrf.mxu1 }
 0x329   : > { %3727 = vst [vmem:[%s5845_s7 + $0x44c] sm:$0xf] %v4502_v16  ;;  %v1466_v21 = vpop.f32.mrf.mxu0  ;;  %v4498_v42 = vpack.c.bf16 %v2108_v53, %v2108_v53 }
 0x32a   : > { %v4473_v55 = vpack.c.bf16 %v1466_v21, %v1464_v34  ;;  %v4739_v28 = vpop.f32.mrf.mxu1 }
 0x32b   : > { %3723 = vst [vmem:[%s5845_s7 + $0x434] sm:$0xf] %v4498_v42  ;;  %v1470_v5 = vpop.f32.mrf.mxu0  ;;  %v4508_v6 = vpack.c.bf16 %v4739_v28, %v4739_v28 }
 0x32c   : > { %3698 = vst [vmem:[%s5845_s7 + $0x39c] sm:$0xff] %v4473_v55  ;;  %v2121_v29 = vpop.f32.mrf.mxu1 }
 0x32d   : > { %3733 = vst [vmem:[%s5845_s7 + $0x470] sm:$0xf] %v4508_v6  ;;  %v1472_v32 = vpop.f32.mrf.mxu0  ;;  %v4504_v25 = vpack.c.bf16 %v2121_v29, %v2121_v29 }
 0x32e   : > { %v4475_v7 = vpack.c.bf16 %v1472_v32, %v1470_v5  ;;  %v4740_v56 = vpop.f32.mrf.mxu1 }
 0x32f   : > { %3729 = vst [vmem:[%s5845_s7 + $0x458] sm:$0xf] %v4504_v25  ;;  %v1474_v33 = vpop.f32.mrf.mxu0  ;;  %v4510_v51 = vpack.c.bf16 %v4740_v56, %v4740_v56 }
 0x330   : > { %3700 = vst [vmem:[%s5845_s7 + $0x3a8] sm:$0xff] %v4475_v7  ;;  %v2124_v60 = vpop.f32.mrf.mxu1 }
 0x331   : > { %3735 = vst [vmem:[%s5845_s7 + $0x47c] sm:$0xf] %v4510_v51  ;;  %v1476_v48 = vpop.f32.mrf.mxu0  ;;  %v4506_v43 = vpack.c.bf16 %v2124_v60, %v2124_v60 }
 0x332   : > { %v4477_v0 = vpack.c.bf16 %v1476_v48, %v1474_v33  ;;  %v4743_v23 = vpop.f32.mrf.mxu1 }
 0x333   : > { %3731 = vst [vmem:[%s5845_s7 + $0x464] sm:$0xf] %v4506_v43  ;;  %v1480_v2 = vpop.f32.mrf.mxu0  ;;  %v4516_v14 = vpack.c.bf16 %v4743_v23, %v4743_v23 }
 0x334   : > { %3702 = vst [vmem:[%s5845_s7 + $0x3b4] sm:$0xff] %v4477_v0  ;;  %v2137_v18 = vpop.f32.mrf.mxu1 }
 0x335   : > { %3741 = vst [vmem:[%s5845_s7 + $0x4a0] sm:$0xf] %v4516_v14  ;;  %v1482_v8 = vpop.f32.mrf.mxu0  ;;  %v4512_v39 = vpack.c.bf16 %v2137_v18, %v2137_v18 }
 0x336   : > { %v4479_v11 = vpack.c.bf16 %v1482_v8, %v1480_v2  ;;  %v4744_v46 = vpop.f32.mrf.mxu1 }
 0x337   : > { %3737 = vst [vmem:[%s5845_s7 + $0x488] sm:$0xf] %v4512_v39  ;;  %v1484_v12 = vpop.f32.mrf.mxu0  ;;  %v4518_v36 = vpack.c.bf16 %v4744_v46, %v4744_v46 }
 0x338   : > { %3704 = vst [vmem:[%s5845_s7 + $0x3c0] sm:$0xff] %v4479_v11  ;;  %v2140_v35 = vpop.f32.mrf.mxu1 }
 0x339   : > { %3743 = vst [vmem:[%s5845_s7 + $0x4ac] sm:$0xf] %v4518_v36  ;;  %v1486_v13 = vpop.f32.mrf.mxu0  ;;  %v4514_v17 = vpack.c.bf16 %v2140_v35, %v2140_v35 }
 0x33a   : > { %v4481_v38 = vpack.c.bf16 %v1486_v13, %v1484_v12  ;;  %v4747_v22 = vpop.f32.mrf.mxu1 }
 0x33b   : > { %3739 = vst [vmem:[%s5845_s7 + $0x494] sm:$0xf] %v4514_v17  ;;  %v1490_v4 = vpop.f32.mrf.mxu0  ;;  %v4524_v30 = vpack.c.bf16 %v4747_v22, %v4747_v22 }
 0x33c   : > { %3706 = vst [vmem:[%s5845_s7 + $0x3cc] sm:$0xff] %v4481_v38  ;;  %v2153_v15 = vpop.f32.mrf.mxu1 }
 0x33d   : > { %3749 = vst [vmem:[%s5845_s7 + $0x4d0] sm:$0xf] %v4524_v30  ;;  %v1492_v61 = vpop.f32.mrf.mxu0  ;;  %v4520_v63 = vpack.c.bf16 %v2153_v15, %v2153_v15 }
 0x33e   : > { %v4483_v19 = vpack.c.bf16 %v1492_v61, %v1490_v4  ;;  %v4748_v49 = vpop.f32.mrf.mxu1 }
 0x33f   : > { %3745 = vst [vmem:[%s5845_s7 + $0x4b8] sm:$0xf] %v4520_v63  ;;  %v1494_v44 = vpop.f32.mrf.mxu0  ;;  %v4526_v1 = vpack.c.bf16 %v4748_v49, %v4748_v49 }
 0x340   : > { %3708 = vst [vmem:[%s5845_s7 + $0x3d8] sm:$0xff] %v4483_v19  ;;  %v2156_v20 = vpop.f32.mrf.mxu1 }
 0x341   : > { %3751 = vst [vmem:[%s5845_s7 + $0x4dc] sm:$0xf] %v4526_v1  ;;  %v1496_v31 = vpop.f32.mrf.mxu0  ;;  %v4522_v40 = vpack.c.bf16 %v2156_v20, %v2156_v20 }
 0x342   : > { %v4485_v24 = vpack.c.bf16 %v1496_v31, %v1494_v44  ;;  %v4751_v41 = vpop.f32.mrf.mxu1 }
 0x343   : > { %3747 = vst [vmem:[%s5845_s7 + $0x4c4] sm:$0xf] %v4522_v40  ;;  %v1500_v26 = vpop.f32.mrf.mxu0  ;;  %v4532_v10 = vpack.c.bf16 %v4751_v41, %v4751_v41 }
 0x344   : > { %3710 = vst [vmem:[%s5845_s7 + $0x3e4] sm:$0xff] %v4485_v24  ;;  %v2169_v52 = vpop.f32.mrf.mxu1 }
 0x345   : > { %3757 = vst [vmem:[%s5845_s7 + $0x500] sm:$0xf] %v4532_v10  ;;  %v1502_v50 = vpop.f32.mrf.mxu0  ;;  %v4528_v45 = vpack.c.bf16 %v2169_v52, %v2169_v52 }
 0x346   : > { %v4487_v58 = vpack.c.bf16 %v1502_v50, %v1500_v26  ;;  %v4752_v9 = vpop.f32.mrf.mxu1 }
 0x347   : > { %3753 = vst [vmem:[%s5845_s7 + $0x4e8] sm:$0xf] %v4528_v45  ;;  %v1504_v37 = vpop.f32.mrf.mxu0  ;;  %v4534_v57 = vpack.c.bf16 %v4752_v9, %v4752_v9 }
 0x348   : > { %3712 = vst [vmem:[%s5845_s7 + $0x3f0] sm:$0xff] %v4487_v58  ;;  %v2172_v59 = vpop.f32.mrf.mxu1 }
 0x349   : > { %3759 = vst [vmem:[%s5845_s7 + $0x50c] sm:$0xf] %v4534_v57  ;;  %v1506_v54 = vpop.f32.mrf.mxu0  ;;  %v4530_v3 = vpack.c.bf16 %v2172_v59, %v2172_v59 }
 0x34a   : > { %v4489_v27 = vpack.c.bf16 %v1506_v54, %v1504_v37  ;;  %v4755_v47 = vpop.f32.mrf.mxu1 }
 0x34b   : > { %3755 = vst [vmem:[%s5845_s7 + $0x4f4] sm:$0xf] %v4530_v3  ;;  %v1510_v62 = vpop.f32.mrf.mxu0  ;;  %v4540_v34 = vpack.c.bf16 %v4755_v47, %v4755_v47 }
 0x34c   : > { %3714 = vst [vmem:[%s5845_s7 + $0x3fc] sm:$0xff] %v4489_v27  ;;  %v2185_v16 = vpop.f32.mrf.mxu1 }
 0x34d   : > { %3765 = vst [vmem:[%s5845_s7 + $0x530] sm:$0xf] %v4540_v34  ;;  %v1512_v53 = vpop.f32.mrf.mxu0  ;;  %v4536_v21 = vpack.c.bf16 %v2185_v16, %v2185_v16 }
 0x34e   : > { %v4491_v42 = vpack.c.bf16 %v1512_v53, %v1510_v62  ;;  %v4756_v55 = vpop.f32.mrf.mxu1 }
 0x34f   : > { %3761 = vst [vmem:[%s5845_s7 + $0x518] sm:$0xf] %v4536_v21  ;;  %v1514_v28 = vpop.f32.mrf.mxu0  ;;  %v4542_v5 = vpack.c.bf16 %v4756_v55, %v4756_v55 }
 0x350   : > { %3716 = vst [vmem:[%s5845_s7 + $0x408] sm:$0xff] %v4491_v42  ;;  %v2188_v6 = vpop.f32.mrf.mxu1 }
 0x351   : > { %3767 = vst [vmem:[%s5845_s7 + $0x53c] sm:$0xf] %v4542_v5  ;;  %v1516_v29 = vpop.f32.mrf.mxu0  ;;  %v4538_v32 = vpack.c.bf16 %v2188_v6, %v2188_v6 }
 0x352   : > { %v4493_v25 = vpack.c.bf16 %v1516_v29, %v1514_v28  ;;  %v4759_v7 = vpop.f32.mrf.mxu1 }
 0x353   : > { %3763 = vst [vmem:[%s5845_s7 + $0x524] sm:$0xf] %v4538_v32  ;;  %v1520_v56 = vpop.f32.mrf.mxu0  ;;  %v4548_v33 = vpack.c.bf16 %v4759_v7, %v4759_v7 }
 0x354   : > { %3718 = vst [vmem:[%s5845_s7 + $0x414] sm:$0xff] %v4493_v25  ;;  %v2201_v51 = vpop.f32.mrf.mxu1 }
 0x355   : > { %3773 = vst [vmem:[%s5845_s7 + $0x560] sm:$0xf] %v4548_v33  ;;  %v1522_v60 = vpop.f32.mrf.mxu0  ;;  %v4544_v48 = vpack.c.bf16 %v2201_v51, %v2201_v51 }
 0x356   : > { %v4495_v43 = vpack.c.bf16 %v1522_v60, %v1520_v56  ;;  %v4760_v0 = vpop.f32.mrf.mxu1 }
 0x357   : > { %3769 = vst [vmem:[%s5845_s7 + $0x548] sm:$0xf] %v4544_v48  ;;  %v1524_v23 = vpop.f32.mrf.mxu0  ;;  %v4550_v2 = vpack.c.bf16 %v4760_v0, %v4760_v0 }
 0x358   : > { %3720 = vst [vmem:[%s5845_s7 + $0x420] sm:$0xff] %v4495_v43  ;;  %v2204_v14 = vpop.f32.mrf.mxu1 }
 0x359   : > { %3775 = vst [vmem:[%s5845_s7 + $0x56c] sm:$0xf] %v4550_v2  ;;  %v1526_v18 = vpop.f32.mrf.mxu0  ;;  %v4546_v8 = vpack.c.bf16 %v2204_v14, %v2204_v14 }
 0x35a   : > { %v4497_v39 = vpack.c.bf16 %v1526_v18, %v1524_v23  ;;  %v4763_v11 = vpop.f32.mrf.mxu1 }
 0x35b   : > { %3771 = vst [vmem:[%s5845_s7 + $0x554] sm:$0xf] %v4546_v8  ;;  %v1530_v46 = vpop.f32.mrf.mxu0  ;;  %v4556_v12 = vpack.c.bf16 %v4763_v11, %v4763_v11 }
 0x35c   : > { %3722 = vst [vmem:[%s5845_s7 + $0x42c] sm:$0xff] %v4497_v39  ;;  %v2217_v36 = vpop.f32.mrf.mxu1 }
 0x35d   : > { %3781 = vst [vmem:[%s5845_s7 + $0x590] sm:$0xf] %v4556_v12  ;;  %v1532_v35 = vpop.f32.mrf.mxu0  ;;  %v4552_v13 = vpack.c.bf16 %v2217_v36, %v2217_v36 }
 0x35e   : > { %v4499_v17 = vpack.c.bf16 %v1532_v35, %v1530_v46  ;;  %v4764_v38 = vpop.f32.mrf.mxu1 }
 0x35f   : > { %3777 = vst [vmem:[%s5845_s7 + $0x578] sm:$0xf] %v4552_v13  ;;  %v1534_v22 = vpop.f32.mrf.mxu0  ;;  %v4558_v4 = vpack.c.bf16 %v4764_v38, %v4764_v38 }
 0x360   : > { %3724 = vst [vmem:[%s5845_s7 + $0x438] sm:$0xff] %v4499_v17  ;;  %v2220_v30 = vpop.f32.mrf.mxu1 }
 0x361   : > { %3783 = vst [vmem:[%s5845_s7 + $0x59c] sm:$0xf] %v4558_v4  ;;  %v1536_v15 = vpop.f32.mrf.mxu0  ;;  %v4554_v61 = vpack.c.bf16 %v2220_v30, %v2220_v30 }
 0x362   : > { %v4501_v63 = vpack.c.bf16 %v1536_v15, %v1534_v22  ;;  %v4767_v19 = vpop.f32.mrf.mxu1 }
 0x363   : > { %3779 = vst [vmem:[%s5845_s7 + $0x584] sm:$0xf] %v4554_v61  ;;  %v1540_v49 = vpop.f32.mrf.mxu0  ;;  %v4564_v44 = vpack.c.bf16 %v4767_v19, %v4767_v19 }
 0x364   : > { %3726 = vst [vmem:[%s5845_s7 + $0x444] sm:$0xff] %v4501_v63  ;;  %v2233_v1 = vpop.f32.mrf.mxu1 }
 0x365   : > { %3789 = vst [vmem:[%s5845_s7 + $0x5c0] sm:$0xf] %v4564_v44  ;;  %v1542_v20 = vpop.f32.mrf.mxu0  ;;  %v4560_v31 = vpack.c.bf16 %v2233_v1, %v2233_v1 }
 0x366   : > { %v4503_v40 = vpack.c.bf16 %v1542_v20, %v1540_v49  ;;  %v4768_v24 = vpop.f32.mrf.mxu1 }
 0x367   : > { %3785 = vst [vmem:[%s5845_s7 + $0x5a8] sm:$0xf] %v4560_v31  ;;  %v1544_v41 = vpop.f32.mrf.mxu0  ;;  %v4566_v26 = vpack.c.bf16 %v4768_v24, %v4768_v24 }
 0x368   : > { %3728 = vst [vmem:[%s5845_s7 + $0x450] sm:$0xff] %v4503_v40  ;;  %v2236_v10 = vpop.f32.mrf.mxu1 }
 0x369   : > { %3791 = vst [vmem:[%s5845_s7 + $0x5cc] sm:$0xf] %v4566_v26  ;;  %v1546_v52 = vpop.f32.mrf.mxu0  ;;  %v4562_v50 = vpack.c.bf16 %v2236_v10, %v2236_v10 }
 0x36a   : > { %v4505_v45 = vpack.c.bf16 %v1546_v52, %v1544_v41  ;;  %v4771_v58 = vpop.f32.mrf.mxu1 }
 0x36b   : > { %3787 = vst [vmem:[%s5845_s7 + $0x5b4] sm:$0xf] %v4562_v50  ;;  %v1550_v9 = vpop.f32.mrf.mxu0  ;;  %v4572_v37 = vpack.c.bf16 %v4771_v58, %v4771_v58 }
 0x36c   : > { %3730 = vst [vmem:[%s5845_s7 + $0x45c] sm:$0xff] %v4505_v45  ;;  %v2249_v57 = vpop.f32.mrf.mxu1 }
 0x36d   : > { %3797 = vst [vmem:[%s5845_s7 + $0x5f0] sm:$0xf] %v4572_v37  ;;  %v1552_v59 = vpop.f32.mrf.mxu0  ;;  %v4568_v54 = vpack.c.bf16 %v2249_v57, %v2249_v57 }
 0x36e   : > { %v4507_v3 = vpack.c.bf16 %v1552_v59, %v1550_v9  ;;  %v4772_v27 = vpop.f32.mrf.mxu1 }
 0x36f   : > { %3793 = vst [vmem:[%s5845_s7 + $0x5d8] sm:$0xf] %v4568_v54  ;;  %v1554_v47 = vpop.f32.mrf.mxu0  ;;  %v4574_v62 = vpack.c.bf16 %v4772_v27, %v4772_v27 }
 0x370   : > { %3732 = vst [vmem:[%s5845_s7 + $0x468] sm:$0xff] %v4507_v3  ;;  %v2252_v34 = vpop.f32.mrf.mxu1 }
 0x371   : > { %3799 = vst [vmem:[%s5845_s7 + $0x5fc] sm:$0xf] %v4574_v62  ;;  %v1556_v16 = vpop.f32.mrf.mxu0  ;;  %v4570_v53 = vpack.c.bf16 %v2252_v34, %v2252_v34 }
 0x372   : > { %v4509_v21 = vpack.c.bf16 %v1556_v16, %v1554_v47 }
 0x373   : > { %3795 = vst [vmem:[%s5845_s7 + $0x5e4] sm:$0xf] %v4570_v53 }
 0x374   : > { %3734 = vst [vmem:[%s5845_s7 + $0x474] sm:$0xff] %v4509_v21 }
 0x375   : > { %4952 = shalt.err (!%p4949_p5)
}
 0x376   : > { %s4953_s12 = scalar_lea.hbm %s6278_s24, 24576  ;;  %s4957_s3 = scalar_lea.hbm %s6334_s4, 49152 }
 0x377   : > { %p4954_p7 = scmp.ne.s32.totalorder %s6278_s24, %s4953_s12  ;;  %p4958_p9 = scmp.lt.s32.totalorder %s6278_s24, %s6334_s4 }
 0x378   : > { %p4959_p11 = scmp.lt.s32.totalorder %s4957_s3, %s4953_s12 }
 0x379   : > { %p4955_p6 = pnand %p4954_p7, %p5147_p13 }
 0x37a   : > { %p4960_p12 = por %p4959_p11, %p4958_p9 }
 0x37b   : > { %p4956_p4 = pneg %p4955_p6 }
 0x37d   : > { %p4961_p1 = pnand %p4960_p12, %p4956_p4 }
 0x37f   : > { %4964 = shalt.err (!%p4961_p1)
}
 0x380   : > { %s5033_s7 = smov 192   ;;  %s5034_s25 = smov 12  }
 0x381   : > { %4785 = dma.vmem_to_hbm [thread:$0]  (%p5147_p13), %s6280_s8, 24576, %s6278_s24, %s3801_s18, %s5033_s7, %s5033_s7, %s5034_s25  }
 0x382 PF: > { %s3832_s23 = sand.u32 1, %s5003_s15   ;;  %p6354_p8 = scmp.ne.s32.totalorder %s6343_s26, 0 }
 0x383   : > { %p6355_p10 = scmp.ge.s32.totalorder %s5023_s20, 2  ;;  %s3833_s9 = scalar_lea.sflag [#allocation4], %s3832_s23 }
 0x385   : > { %p4796_p0 = pnand %p6355_p10, %p6354_p8 }
 0x387   : > { %p4797_p2 = pneg %p4796_p0 }
 0x389   : > { %4998 = dma.done.wait (%p4797_p2), %s3833_s9, 24576  }
 0x38a   : > { %5000 = vsyncadd (%p4797_p2), %s3833_s9, 4294942720  ;;  %s21_s20 = sadd.s32 1, %s5023_s20   ;;  %s6356_s15 = smov %s5007_s16 }
 0x38b   : > { %p18_p3 = scmp.ge.s32.totalorder %s21_s20, 4   ;;  %s6357_s16 = smov %s5011_s17 }
 0x38c   : > { %s6358_s17 = smov %s5156_s28  ;;  %s6359_s18 = smov %s5019_s19 }
 0x38d   : > { %s6360_s19 = smov %s6362_s5  ;;  %20 = sbr.rel (!%p18_p3) target bundleno = 9 (0x9), region = 85 }
 0x392   :  { %3838 = vsyncpa [#allocation3], 1 }
 0x393   :  { %3840 = vsyncpa [#allocation3 + $0x1], 1 }
 0x394   :  { %3841 = vsyncpa [#allocation6], 1 }
 0x395   :  { %3842 = vsyncpa [#allocation4], 1 }
 0x396   :  { %3844 = vsyncpa [#allocation4 + $0x1], 1 }

</bundles_post_ra>
